<compile_context>
chip_gen: v7x
topology: tpu7x:2x2x1
jax: 0.10.0
libtpu: 0.0.40
codegen_flags: <defaults>
</compile_context>

<pallas_src>
import jax
import jax.numpy as jnp
from jax import lax
from jax.experimental import pallas as pl
from jax.experimental.pallas import tpu as pltpu

# cfg = [(8, 4), (8, 8), (16, 8), 16]  ->
#   convDW1: Conv2d(4 -> 8,  k=5, pad=2, bias=False)
#   convDW2: Conv2d(8 -> 8,  k=5, pad=2, groups=8, bias=False)  (depthwise)
#   convPW2: Conv2d(8 -> 16, k=1, bias=True)
#   bn     : BatchNorm2d(16) (fresh module => training mode, batch stats)
N, H, W = 2, 16, 16
C_IN, C1, C2 = 4, 8, 16
K = 5
PAD = K // 2
EPS = 1e-5


def blockdw2_kernel(x_ref, w1_ref, w2_ref, w3_ref, b3_ref, gamma_ref, beta_ref,
                    g_ref, gt_ref, out_ref, pad1_ref, pad2_ref):
    f32 = jnp.float32

    # ---- convDW1: 5x5 full conv as 5 Toeplitz matmuls (one per kh) -----------
    # H-halo lives in a small VMEM scratch; only halo rows are zeroed.
    pad1_ref[:, 0:PAD, :] = jnp.zeros((N, PAD, W * C_IN), f32)
    pad1_ref[:, H + PAD:H + 2 * PAD, :] = jnp.zeros((N, PAD, W * C_IN), f32)
    pad1_ref[:, PAD:PAD + H, :] = x_ref[...]

    acc1 = jnp.zeros((N * H, W * C1), f32)
    for kh in range(K):                     # 5 taps: (32,64) @ (64,128) on MXU
        rows = pad1_ref[:, kh:kh + H, :].reshape(N * H, W * C_IN)
        acc1 = acc1 + jnp.dot(rows, w1_ref[kh], preferred_element_type=f32)
    relu1 = jnp.maximum(acc1, 0.0)          # (32, 128) lane-dense

    # ---- convDW2: 5x5 depthwise as 5 block-banded matmuls (one per kh) -------
    pad2_ref[:, 0:PAD, :] = jnp.zeros((N, PAD, W * C1), f32)
    pad2_ref[:, H + PAD:H + 2 * PAD, :] = jnp.zeros((N, PAD, W * C1), f32)
    pad2_ref[:, PAD:PAD + H, :] = relu1.reshape(N, H, W * C1)

    acc2 = jnp.zeros((N * H, W * C1), f32)
    for kh in range(K):                     # 5 taps: (32,128) @ (128,128) on MXU
        rows = pad2_ref[:, kh:kh + H, :].reshape(N * H, W * C1)
        acc2 = acc2 + jnp.dot(rows, w2_ref[kh], preferred_element_type=f32)
    relu2 = jnp.maximum(acc2, 0.0)          # (32, 128) lane-dense

    # ---- convPW2: 1x1 conv as one block-diagonal matmul + tiled bias ---------
    y = jnp.dot(relu2, w3_ref[...], preferred_element_type=f32) + b3_ref[...]
    # y: (32, 256) = (N*H, W*C2), lane-dense

    # ---- BatchNorm2d (training-mode biased batch stats), one pass ------------
    inv_cnt = 1.0 / float(N * H * W)
    rs1 = jnp.sum(y, axis=0, keepdims=True)          # (1, W*C2)  sum over rows
    rs2 = jnp.sum(y * y, axis=0, keepdims=True)      # (1, W*C2)
    # reduce the 16 w-groups on the lane axis down to per-channel sums (MXU)
    mean_c = jnp.dot(rs1, g_ref[...], preferred_element_type=f32) * inv_cnt   # (1, C2)
    ex2_c = jnp.dot(rs2, g_ref[...], preferred_element_type=f32) * inv_cnt    # (1, C2)
    var_c = ex2_c - mean_c * mean_c
    # broadcast per-channel stats back to the lane-dense (1, W*C2) layout (MXU)
    mean_t = jnp.dot(mean_c, gt_ref[...], preferred_element_type=f32)
    var_t = jnp.dot(var_c, gt_ref[...], preferred_element_type=f32)
    # fold BN affine into a single scale/shift FMA
    scale_t = gamma_ref[...] * lax.rsqrt(var_t + EPS)
    shift_t = beta_ref[...] - mean_t * scale_t

    # ---- final ReLU + lane-dense (32, 256) store ------------------------------
    out_ref[...] = jnp.maximum(y * scale_t + shift_t, 0.0)


def _pack_params(w1, w2, w3, b3, gamma, beta):
    """Wrapper-side layout plumbing: build lane-dense / Toeplitz weights."""
    f32 = jnp.float32
    wi = jnp.arange(W)[:, None]             # input w position
    wo = jnp.arange(W)[None, :]             # output w position
    kw = wi - wo + PAD                      # which kw tap connects wi -> wo
    valid = (kw >= 0) & (kw < K)            # also encodes the W-boundary zeros
    kw_c = jnp.clip(kw, 0, K - 1)

    # convDW1 Toeplitz: (K, W*C_IN, W*C1);  [kh, wi*C_IN+ci, wo*C1+co]
    w1_perm = jnp.transpose(w1.astype(f32), (2, 3, 1, 0))          # (K,K,C_IN,C1)
    g1 = jnp.where(valid[None, :, :, None, None], w1_perm[:, kw_c, :, :], 0.0)
    w1_toep = jnp.transpose(g1, (0, 1, 3, 2, 4)).reshape(K, W * C_IN, W * C1)

    # convDW2 block-banded: (K, W*C1, W*C1);  nonzero only for same channel
    w2_perm = jnp.transpose(w2[:, 0, :, :].astype(f32), (1, 2, 0))  # (K,K,C1)
    g2 = jnp.where(valid[None, :, :, None], w2_perm[:, kw_c, :], 0.0)
    eye_c1 = jnp.eye(C1, dtype=f32)
    w2_toep = jnp.einsum("kxyc,dc->kxdyc", g2, eye_c1).reshape(K, W * C1, W * C1)

    # convPW2 block-diagonal: (W*C1, W*C2)
    w3m = jnp.transpose(w3[:, :, 0, 0].astype(f32), (1, 0))         # (C1, C2)
    eye_w = jnp.eye(W, dtype=f32)
    w3_blk = jnp.einsum("xy,ab->xayb", eye_w, w3m).reshape(W * C1, W * C2)

    # lane-tiled per-channel rows
    b3_t = jnp.tile(b3.astype(f32).reshape(1, C2), (1, W))          # (1, W*C2)
    gamma_t = jnp.tile(gamma.astype(f32).reshape(1, C2), (1, W))
    beta_t = jnp.tile(beta.astype(f32).reshape(1, C2), (1, W))

    # per-channel gather / broadcast matrices for BN stats
    gmat = jnp.tile(jnp.eye(C2, dtype=f32), (W, 1))                 # (W*C2, C2)
    gmat_t = jnp.transpose(gmat)                                    # (C2, W*C2)
    return w1_toep, w2_toep, w3_blk, b3_t, gamma_t, beta_t, gmat, gmat_t


def blockdw2_forward(x_nchw, w1, w2, w3, b3, gamma, beta):
    """x_nchw: (N, C_IN, H, W); weights in PyTorch OIHW layout."""
    (w1_toep, w2_toep, w3_blk, b3_t, gamma_t, beta_t,
     gmat, gmat_t) = _pack_params(w1, w2, w3, b3, gamma, beta)
    x_packed = jnp.transpose(x_nchw.astype(jnp.float32),
                             (0, 2, 3, 1)).reshape(N, H, W * C_IN)

    out_flat = pl.pallas_call(
        blockdw2_kernel,
        out_shape=jax.ShapeDtypeStruct((N * H, W * C2), jnp.float32),
        in_specs=[pl.BlockSpec(memory_space=pltpu.MemorySpace.VMEM)] * 9,
        out_specs=pl.BlockSpec(memory_space=pltpu.MemorySpace.VMEM),
        scratch_shapes=[
            pltpu.VMEM((N, H + 2 * PAD, W * C_IN), jnp.float32),   # conv1 H-halo
            pltpu.VMEM((N, H + 2 * PAD, W * C1), jnp.float32),     # conv2 H-halo
        ],
    )(x_packed, w1_toep, w2_toep, w3_blk, b3_t, gamma_t, beta_t, gmat, gmat_t)

    out_nhwc = out_flat.reshape(N, H, W, C2)
    return jnp.transpose(out_nhwc, (0, 3, 1, 2))                   # back to NCHW


def reference_forward(x, w1, w2, w3, b3, gamma, beta):
    dn = ('NCHW', 'OIHW', 'NCHW')
    y = lax.conv_general_dilated(x, w1, (1, 1), 'SAME', dimension_numbers=dn)
    y = jnp.maximum(y, 0.0)
    y = lax.conv_general_dilated(y, w2, (1, 1), 'SAME',
                                 feature_group_count=C1, dimension_numbers=dn)
    y = jnp.maximum(y, 0.0)
    y = lax.conv_general_dilated(y, w3, (1, 1), 'SAME', dimension_numbers=dn)
    y = y + b3[None, :, None, None]
    mean = jnp.mean(y, axis=(0, 2, 3), keepdims=True)
    var = jnp.mean((y - mean) ** 2, axis=(0, 2, 3), keepdims=True)
    y = (y - mean) * lax.rsqrt(var + EPS)
    y = y * gamma[None, :, None, None] + beta[None, :, None, None]
    return jnp.maximum(y, 0.0)


if __name__ == "__main__":
    key = jax.random.PRNGKey(0)
    kx, k1, k2, k3, kb, kg, kbt = jax.random.split(key, 7)

    x = jax.random.normal(kx, (N, C_IN, H, W), jnp.float32)
    w1 = 0.1 * jax.random.normal(k1, (C1, C_IN, K, K), jnp.float32)   # convDW1
    w2 = 0.1 * jax.random.normal(k2, (C1, 1, K, K), jnp.float32)      # convDW2 (depthwise)
    w3 = 0.1 * jax.random.normal(k3, (C2, C1, 1, 1), jnp.float32)     # convPW2
    b3 = 0.1 * jax.random.normal(kb, (C2,), jnp.float32)
    gamma = 1.0 + 0.1 * jax.random.normal(kg, (C2,), jnp.float32)     # bn weight
    beta = 0.1 * jax.random.normal(kbt, (C2,), jnp.float32)           # bn bias

    out = blockdw2_forward(x, w1, w2, w3, b3, gamma, beta)
    out = jax.block_until_ready(out)

    ref = jax.block_until_ready(
        reference_forward(x, w1, w2, w3, b3, gamma, beta))

    assert out.shape == (N, C2, H, W), out.shape
    assert jnp.allclose(out, ref, rtol=1e-4, atol=1e-4), (
        float(jnp.max(jnp.abs(out - ref))))
    print("KERNEL_OK")
</pallas_src>

<mosaic_0001>
module attributes {stable_mosaic.version = 11 : i64} {
  func.func @blockdw2_kernel(%arg0: memref<2x16x64xf32, #tpu.memory_space<vmem>>, %arg1: memref<5x64x128xf32, #tpu.memory_space<vmem>>, %arg2: memref<5x128x128xf32, #tpu.memory_space<vmem>>, %arg3: memref<128x256xf32, #tpu.memory_space<vmem>>, %arg4: memref<1x256xf32, #tpu.memory_space<vmem>>, %arg5: memref<1x256xf32, #tpu.memory_space<vmem>>, %arg6: memref<1x256xf32, #tpu.memory_space<vmem>>, %arg7: memref<256x16xf32, #tpu.memory_space<vmem>>, %arg8: memref<16x256xf32, #tpu.memory_space<vmem>>, %arg9: memref<32x256xf32, #tpu.memory_space<vmem>>, %arg10: memref<2x20x64xf32, #tpu.memory_space<vmem>>, %arg11: memref<2x20x128xf32, #tpu.memory_space<vmem>>) attributes {dimension_semantics = [], scalar_prefetch = 0 : i64, scratch_operands = 2 : i64, tpu.core_type = #tpu.core_type<tc>} {
    %cst = arith.constant 0.000000e+00 : f32
    %0 = vector.broadcast %cst : f32 to vector<2x2x64xf32>
    %c0 = arith.constant 0 : index
    %c0_0 = arith.constant 0 : index
    %c0_1 = arith.constant 0 : index
    %1 = vector.load %arg10[%c0, %c0_0, %c0_1] : memref<2x20x64xf32, #tpu.memory_space<vmem>>, vector<2x2x64xf32>
    tpu.vector_store %arg10[%c0, %c0_0, %c0_1], %0 {strides = array<i32>} : memref<2x20x64xf32, #tpu.memory_space<vmem>>, vector<2x2x64xf32>,
    %cst_2 = arith.constant 0.000000e+00 : f32
    %2 = vector.broadcast %cst_2 : f32 to vector<2x2x64xf32>
    %c0_3 = arith.constant 0 : index
    %c18 = arith.constant 18 : index
    %c0_4 = arith.constant 0 : index
    %3 = vector.load %arg10[%c0_3, %c18, %c0_4] : memref<2x20x64xf32, #tpu.memory_space<vmem>>, vector<2x2x64xf32>
    tpu.vector_store %arg10[%c0_3, %c18, %c0_4], %2 {strides = array<i32>} : memref<2x20x64xf32, #tpu.memory_space<vmem>>, vector<2x2x64xf32>,
    %c0_5 = arith.constant 0 : index
    %c0_6 = arith.constant 0 : index
    %c0_7 = arith.constant 0 : index
    %4 = vector.load %arg0[%c0_5, %c0_6, %c0_7] : memref<2x16x64xf32, #tpu.memory_space<vmem>>, vector<2x16x64xf32>
    %c0_8 = arith.constant 0 : index
    %c2 = arith.constant 2 : index
    %c0_9 = arith.constant 0 : index
    %5 = vector.load %arg10[%c0_8, %c2, %c0_9] : memref<2x20x64xf32, #tpu.memory_space<vmem>>, vector<2x16x64xf32>
    tpu.vector_store %arg10[%c0_8, %c2, %c0_9], %4 {strides = array<i32>} : memref<2x20x64xf32, #tpu.memory_space<vmem>>, vector<2x16x64xf32>,
    %cst_10 = arith.constant 0.000000e+00 : f32
    %6 = vector.broadcast %cst_10 : f32 to vector<32x128xf32>
    %c0_11 = arith.constant 0 : index
    %c0_12 = arith.constant 0 : index
    %c0_13 = arith.constant 0 : index
    %7 = vector.load %arg10[%c0_11, %c0_12, %c0_13] : memref<2x20x64xf32, #tpu.memory_space<vmem>>, vector<2x16x64xf32>
    %8 = vector.shape_cast %7 : vector<2x16x64xf32> to vector<32x64xf32>
    %c0_14 = arith.constant 0 : index
    %c0_15 = arith.constant 0 : index
    %c0_16 = arith.constant 0 : index
    %9 = vector.load %arg1[%c0_14, %c0_15, %c0_16] : memref<5x64x128xf32, #tpu.memory_space<vmem>>, vector<1x64x128xf32>
    %10 = vector.shape_cast %9 : vector<1x64x128xf32> to vector<64x128xf32>
    %cst_17 = arith.constant dense<0.000000e+00> : vector<32x128xf32>
    %11 = tpu.matmul %8, %10, %cst_17 {dimension_numbers = #tpu.dot_dimension_numbers<[1], [0], [0], [1], [0, 0, 1, 1], [], []>} : vector<32x64xf32>, vector<64x128xf32>, vector<32x128xf32> -> vector<32x128xf32>
    %12 = arith.addf %6, %11 : vector<32x128xf32>
    %c0_18 = arith.constant 0 : index
    %c1 = arith.constant 1 : index
    %c0_19 = arith.constant 0 : index
    %13 = vector.load %arg10[%c0_18, %c1, %c0_19] : memref<2x20x64xf32, #tpu.memory_space<vmem>>, vector<2x16x64xf32>
    %14 = vector.shape_cast %13 : vector<2x16x64xf32> to vector<32x64xf32>
    %c1_20 = arith.constant 1 : index
    %c0_21 = arith.constant 0 : index
    %c0_22 = arith.constant 0 : index
    %15 = vector.load %arg1[%c1_20, %c0_21, %c0_22] : memref<5x64x128xf32, #tpu.memory_space<vmem>>, vector<1x64x128xf32>
    %16 = vector.shape_cast %15 : vector<1x64x128xf32> to vector<64x128xf32>
    %cst_23 = arith.constant dense<0.000000e+00> : vector<32x128xf32>
    %17 = tpu.matmul %14, %16, %cst_23 {dimension_numbers = #tpu.dot_dimension_numbers<[1], [0], [0], [1], [0, 0, 1, 1], [], []>} : vector<32x64xf32>, vector<64x128xf32>, vector<32x128xf32> -> vector<32x128xf32>
    %18 = arith.addf %12, %17 : vector<32x128xf32>
    %c0_24 = arith.constant 0 : index
    %c2_25 = arith.constant 2 : index
    %c0_26 = arith.constant 0 : index
    %19 = vector.load %arg10[%c0_24, %c2_25, %c0_26] : memref<2x20x64xf32, #tpu.memory_space<vmem>>, vector<2x16x64xf32>
    %20 = vector.shape_cast %19 : vector<2x16x64xf32> to vector<32x64xf32>
    %c2_27 = arith.constant 2 : index
    %c0_28 = arith.constant 0 : index
    %c0_29 = arith.constant 0 : index
    %21 = vector.load %arg1[%c2_27, %c0_28, %c0_29] : memref<5x64x128xf32, #tpu.memory_space<vmem>>, vector<1x64x128xf32>
    %22 = vector.shape_cast %21 : vector<1x64x128xf32> to vector<64x128xf32>
    %cst_30 = arith.constant dense<0.000000e+00> : vector<32x128xf32>
    %23 = tpu.matmul %20, %22, %cst_30 {dimension_numbers = #tpu.dot_dimension_numbers<[1], [0], [0], [1], [0, 0, 1, 1], [], []>} : vector<32x64xf32>, vector<64x128xf32>, vector<32x128xf32> -> vector<32x128xf32>
    %24 = arith.addf %18, %23 : vector<32x128xf32>
    %c0_31 = arith.constant 0 : index
    %c3 = arith.constant 3 : index
    %c0_32 = arith.constant 0 : index
    %25 = vector.load %arg10[%c0_31, %c3, %c0_32] : memref<2x20x64xf32, #tpu.memory_space<vmem>>, vector<2x16x64xf32>
    %26 = vector.shape_cast %25 : vector<2x16x64xf32> to vector<32x64xf32>
    %c3_33 = arith.constant 3 : index
    %c0_34 = arith.constant 0 : index
    %c0_35 = arith.constant 0 : index
    %27 = vector.load %arg1[%c3_33, %c0_34, %c0_35] : memref<5x64x128xf32, #tpu.memory_space<vmem>>, vector<1x64x128xf32>
    %28 = vector.shape_cast %27 : vector<1x64x128xf32> to vector<64x128xf32>
    %cst_36 = arith.constant dense<0.000000e+00> : vector<32x128xf32>
    %29 = tpu.matmul %26, %28, %cst_36 {dimension_numbers = #tpu.dot_dimension_numbers<[1], [0], [0], [1], [0, 0, 1, 1], [], []>} : vector<32x64xf32>, vector<64x128xf32>, vector<32x128xf32> -> vector<32x128xf32>
    %30 = arith.addf %24, %29 : vector<32x128xf32>
    %c0_37 = arith.constant 0 : index
    %c4 = arith.constant 4 : index
    %c0_38 = arith.constant 0 : index
    %31 = vector.load %arg10[%c0_37, %c4, %c0_38] : memref<2x20x64xf32, #tpu.memory_space<vmem>>, vector<2x16x64xf32>
    %32 = vector.shape_cast %31 : vector<2x16x64xf32> to vector<32x64xf32>
    %c4_39 = arith.constant 4 : index
    %c0_40 = arith.constant 0 : index
    %c0_41 = arith.constant 0 : index
    %33 = vector.load %arg1[%c4_39, %c0_40, %c0_41] : memref<5x64x128xf32, #tpu.memory_space<vmem>>, vector<1x64x128xf32>
    %34 = vector.shape_cast %33 : vector<1x64x128xf32> to vector<64x128xf32>
    %cst_42 = arith.constant dense<0.000000e+00> : vector<32x128xf32>
    %35 = tpu.matmul %32, %34, %cst_42 {dimension_numbers = #tpu.dot_dimension_numbers<[1], [0], [0], [1], [0, 0, 1, 1], [], []>} : vector<32x64xf32>, vector<64x128xf32>, vector<32x128xf32> -> vector<32x128xf32>
    %36 = arith.addf %30, %35 : vector<32x128xf32>
    %cst_43 = arith.constant 0.000000e+00 : f32
    %37 = vector.broadcast %cst_43 : f32 to vector<32x128xf32>
    %38 = arith.maximumf %36, %37 : vector<32x128xf32>
    %cst_44 = arith.constant 0.000000e+00 : f32
    %39 = vector.broadcast %cst_44 : f32 to vector<2x2x128xf32>
    %c0_45 = arith.constant 0 : index
    %c0_46 = arith.constant 0 : index
    %c0_47 = arith.constant 0 : index
    %40 = vector.load %arg11[%c0_45, %c0_46, %c0_47] : memref<2x20x128xf32, #tpu.memory_space<vmem>>, vector<2x2x128xf32>
    tpu.vector_store %arg11[%c0_45, %c0_46, %c0_47], %39 {strides = array<i32>} : memref<2x20x128xf32, #tpu.memory_space<vmem>>, vector<2x2x128xf32>,
    %cst_48 = arith.constant 0.000000e+00 : f32
    %41 = vector.broadcast %cst_48 : f32 to vector<2x2x128xf32>
    %c0_49 = arith.constant 0 : index
    %c18_50 = arith.constant 18 : index
    %c0_51 = arith.constant 0 : index
    %42 = vector.load %arg11[%c0_49, %c18_50, %c0_51] : memref<2x20x128xf32, #tpu.memory_space<vmem>>, vector<2x2x128xf32>
    tpu.vector_store %arg11[%c0_49, %c18_50, %c0_51], %41 {strides = array<i32>} : memref<2x20x128xf32, #tpu.memory_space<vmem>>, vector<2x2x128xf32>,
    %43 = vector.shape_cast %38 : vector<32x128xf32> to vector<2x16x128xf32>
    %c0_52 = arith.constant 0 : index
    %c2_53 = arith.constant 2 : index
    %c0_54 = arith.constant 0 : index
    %44 = vector.load %arg11[%c0_52, %c2_53, %c0_54] : memref<2x20x128xf32, #tpu.memory_space<vmem>>, vector<2x16x128xf32>
    tpu.vector_store %arg11[%c0_52, %c2_53, %c0_54], %43 {strides = array<i32>} : memref<2x20x128xf32, #tpu.memory_space<vmem>>, vector<2x16x128xf32>,
    %cst_55 = arith.constant 0.000000e+00 : f32
    %45 = vector.broadcast %cst_55 : f32 to vector<32x128xf32>
    %c0_56 = arith.constant 0 : index
    %c0_57 = arith.constant 0 : index
    %c0_58 = arith.constant 0 : index
    %46 = vector.load %arg11[%c0_56, %c0_57, %c0_58] : memref<2x20x128xf32, #tpu.memory_space<vmem>>, vector<2x16x128xf32>
    %47 = vector.shape_cast %46 : vector<2x16x128xf32> to vector<32x128xf32>
    %c0_59 = arith.constant 0 : index
    %c0_60 = arith.constant 0 : index
    %c0_61 = arith.constant 0 : index
    %48 = vector.load %arg2[%c0_59, %c0_60, %c0_61] : memref<5x128x128xf32, #tpu.memory_space<vmem>>, vector<1x128x128xf32>
    %49 = vector.shape_cast %48 : vector<1x128x128xf32> to vector<128x128xf32>
    %cst_62 = arith.constant dense<0.000000e+00> : vector<32x128xf32>
    %50 = tpu.matmul %47, %49, %cst_62 {dimension_numbers = #tpu.dot_dimension_numbers<[1], [0], [0], [1], [0, 0, 1, 1], [], []>} : vector<32x128xf32>, vector<128x128xf32>, vector<32x128xf32> -> vector<32x128xf32>
    %51 = arith.addf %45, %50 : vector<32x128xf32>
    %c0_63 = arith.constant 0 : index
    %c1_64 = arith.constant 1 : index
    %c0_65 = arith.constant 0 : index
    %52 = vector.load %arg11[%c0_63, %c1_64, %c0_65] : memref<2x20x128xf32, #tpu.memory_space<vmem>>, vector<2x16x128xf32>
    %53 = vector.shape_cast %52 : vector<2x16x128xf32> to vector<32x128xf32>
    %c1_66 = arith.constant 1 : index
    %c0_67 = arith.constant 0 : index
    %c0_68 = arith.constant 0 : index
    %54 = vector.load %arg2[%c1_66, %c0_67, %c0_68] : memref<5x128x128xf32, #tpu.memory_space<vmem>>, vector<1x128x128xf32>
    %55 = vector.shape_cast %54 : vector<1x128x128xf32> to vector<128x128xf32>
    %cst_69 = arith.constant dense<0.000000e+00> : vector<32x128xf32>
    %56 = tpu.matmul %53, %55, %cst_69 {dimension_numbers = #tpu.dot_dimension_numbers<[1], [0], [0], [1], [0, 0, 1, 1], [], []>} : vector<32x128xf32>, vector<128x128xf32>, vector<32x128xf32> -> vector<32x128xf32>
    %57 = arith.addf %51, %56 : vector<32x128xf32>
    %c0_70 = arith.constant 0 : index
    %c2_71 = arith.constant 2 : index
    %c0_72 = arith.constant 0 : index
    %58 = vector.load %arg11[%c0_70, %c2_71, %c0_72] : memref<2x20x128xf32, #tpu.memory_space<vmem>>, vector<2x16x128xf32>
    %59 = vector.shape_cast %58 : vector<2x16x128xf32> to vector<32x128xf32>
    %c2_73 = arith.constant 2 : index
    %c0_74 = arith.constant 0 : index
    %c0_75 = arith.constant 0 : index
    %60 = vector.load %arg2[%c2_73, %c0_74, %c0_75] : memref<5x128x128xf32, #tpu.memory_space<vmem>>, vector<1x128x128xf32>
    %61 = vector.shape_cast %60 : vector<1x128x128xf32> to vector<128x128xf32>
    %cst_76 = arith.constant dense<0.000000e+00> : vector<32x128xf32>
    %62 = tpu.matmul %59, %61, %cst_76 {dimension_numbers = #tpu.dot_dimension_numbers<[1], [0], [0], [1], [0, 0, 1, 1], [], []>} : vector<32x128xf32>, vector<128x128xf32>, vector<32x128xf32> -> vector<32x128xf32>
    %63 = arith.addf %57, %62 : vector<32x128xf32>
    %c0_77 = arith.constant 0 : index
    %c3_78 = arith.constant 3 : index
    %c0_79 = arith.constant 0 : index
    %64 = vector.load %arg11[%c0_77, %c3_78, %c0_79] : memref<2x20x128xf32, #tpu.memory_space<vmem>>, vector<2x16x128xf32>
    %65 = vector.shape_cast %64 : vector<2x16x128xf32> to vector<32x128xf32>
    %c3_80 = arith.constant 3 : index
    %c0_81 = arith.constant 0 : index
    %c0_82 = arith.constant 0 : index
    %66 = vector.load %arg2[%c3_80, %c0_81, %c0_82] : memref<5x128x128xf32, #tpu.memory_space<vmem>>, vector<1x128x128xf32>
    %67 = vector.shape_cast %66 : vector<1x128x128xf32> to vector<128x128xf32>
    %cst_83 = arith.constant dense<0.000000e+00> : vector<32x128xf32>
    %68 = tpu.matmul %65, %67, %cst_83 {dimension_numbers = #tpu.dot_dimension_numbers<[1], [0], [0], [1], [0, 0, 1, 1], [], []>} : vector<32x128xf32>, vector<128x128xf32>, vector<32x128xf32> -> vector<32x128xf32>
    %69 = arith.addf %63, %68 : vector<32x128xf32>
    %c0_84 = arith.constant 0 : index
    %c4_85 = arith.constant 4 : index
    %c0_86 = arith.constant 0 : index
    %70 = vector.load %arg11[%c0_84, %c4_85, %c0_86] : memref<2x20x128xf32, #tpu.memory_space<vmem>>, vector<2x16x128xf32>
    %71 = vector.shape_cast %70 : vector<2x16x128xf32> to vector<32x128xf32>
    %c4_87 = arith.constant 4 : index
    %c0_88 = arith.constant 0 : index
    %c0_89 = arith.constant 0 : index
    %72 = vector.load %arg2[%c4_87, %c0_88, %c0_89] : memref<5x128x128xf32, #tpu.memory_space<vmem>>, vector<1x128x128xf32>
    %73 = vector.shape_cast %72 : vector<1x128x128xf32> to vector<128x128xf32>
    %cst_90 = arith.constant dense<0.000000e+00> : vector<32x128xf32>
    %74 = tpu.matmul %71, %73, %cst_90 {dimension_numbers = #tpu.dot_dimension_numbers<[1], [0], [0], [1], [0, 0, 1, 1], [], []>} : vector<32x128xf32>, vector<128x128xf32>, vector<32x128xf32> -> vector<32x128xf32>
    %75 = arith.addf %69, %74 : vector<32x128xf32>
    %cst_91 = arith.constant 0.000000e+00 : f32
    %76 = vector.broadcast %cst_91 : f32 to vector<32x128xf32>
    %77 = arith.maximumf %75, %76 : vector<32x128xf32>
    %c0_92 = arith.constant 0 : index
    %c0_93 = arith.constant 0 : index
    %78 = vector.load %arg3[%c0_92, %c0_93] : memref<128x256xf32, #tpu.memory_space<vmem>>, vector<128x256xf32>
    %cst_94 = arith.constant dense<0.000000e+00> : vector<32x256xf32>
    %79 = tpu.matmul %77, %78, %cst_94 {dimension_numbers = #tpu.dot_dimension_numbers<[1], [0], [0], [1], [0, 0, 1, 1], [], []>} : vector<32x128xf32>, vector<128x256xf32>, vector<32x256xf32> -> vector<32x256xf32>
    %c0_95 = arith.constant 0 : index
    %c0_96 = arith.constant 0 : index
    %80 = vector.load %arg4[%c0_95, %c0_96] : memref<1x256xf32, #tpu.memory_space<vmem>>, vector<1x256xf32>
    %81 = vector.broadcast %80 : vector<1x256xf32> to vector<32x256xf32>
    %82 = arith.addf %79, %81 : vector<32x256xf32>
    %cst_97 = arith.constant dense<0.000000e+00> : vector<256xf32>
    %83 = vector.multi_reduction <add>, %82, %cst_97 [0] : vector<32x256xf32> to vector<256xf32>
    %84 = vector.shape_cast %83 : vector<256xf32> to vector<1x256xf32>
    %85 = arith.mulf %82, %82 : vector<32x256xf32>
    %cst_98 = arith.constant dense<0.000000e+00> : vector<256xf32>
    %86 = vector.multi_reduction <add>, %85, %cst_98 [0] : vector<32x256xf32> to vector<256xf32>
    %87 = vector.shape_cast %86 : vector<256xf32> to vector<1x256xf32>
    %c0_99 = arith.constant 0 : index
    %c0_100 = arith.constant 0 : index
    %88 = vector.load %arg7[%c0_99, %c0_100] : memref<256x16xf32, #tpu.memory_space<vmem>>, vector<256x16xf32>
    %cst_101 = arith.constant dense<0.000000e+00> : vector<1x16xf32>
    %89 = tpu.matmul %84, %88, %cst_101 {dimension_numbers = #tpu.dot_dimension_numbers<[1], [0], [0], [1], [0, 0, 1, 1], [], []>} : vector<1x256xf32>, vector<256x16xf32>, vector<1x16xf32> -> vector<1x16xf32>
    %cst_102 = arith.constant 0.001953125 : f32
    %90 = vector.broadcast %cst_102 : f32 to vector<1x16xf32>
    %91 = arith.mulf %89, %90 : vector<1x16xf32>
    %c0_103 = arith.constant 0 : index
    %c0_104 = arith.constant 0 : index
    %92 = vector.load %arg7[%c0_103, %c0_104] : memref<256x16xf32, #tpu.memory_space<vmem>>, vector<256x16xf32>
    %cst_105 = arith.constant dense<0.000000e+00> : vector<1x16xf32>
    %93 = tpu.matmul %87, %92, %cst_105 {dimension_numbers = #tpu.dot_dimension_numbers<[1], [0], [0], [1], [0, 0, 1, 1], [], []>} : vector<1x256xf32>, vector<256x16xf32>, vector<1x16xf32> -> vector<1x16xf32>
    %cst_106 = arith.constant 0.001953125 : f32
    %94 = vector.broadcast %cst_106 : f32 to vector<1x16xf32>
    %95 = arith.mulf %93, %94 : vector<1x16xf32>
    %96 = arith.mulf %91, %91 : vector<1x16xf32>
    %97 = arith.subf %95, %96 : vector<1x16xf32>
    %c0_107 = arith.constant 0 : index
    %c0_108 = arith.constant 0 : index
    %98 = vector.load %arg8[%c0_107, %c0_108] : memref<16x256xf32, #tpu.memory_space<vmem>>, vector<16x256xf32>
    %cst_109 = arith.constant dense<0.000000e+00> : vector<1x256xf32>
    %99 = tpu.matmul %91, %98, %cst_109 {dimension_numbers = #tpu.dot_dimension_numbers<[1], [0], [0], [1], [0, 0, 1, 1], [], []>} : vector<1x16xf32>, vector<16x256xf32>, vector<1x256xf32> -> vector<1x256xf32>
    %c0_110 = arith.constant 0 : index
    %c0_111 = arith.constant 0 : index
    %100 = vector.load %arg8[%c0_110, %c0_111] : memref<16x256xf32, #tpu.memory_space<vmem>>, vector<16x256xf32>
    %cst_112 = arith.constant dense<0.000000e+00> : vector<1x256xf32>
    %101 = tpu.matmul %97, %100, %cst_112 {dimension_numbers = #tpu.dot_dimension_numbers<[1], [0], [0], [1], [0, 0, 1, 1], [], []>} : vector<1x16xf32>, vector<16x256xf32>, vector<1x256xf32> -> vector<1x256xf32>
    %c0_113 = arith.constant 0 : index
    %c0_114 = arith.constant 0 : index
    %102 = vector.load %arg5[%c0_113, %c0_114] : memref<1x256xf32, #tpu.memory_space<vmem>>, vector<1x256xf32>
    %cst_115 = arith.constant 9.99999974E-6 : f32
    %103 = vector.broadcast %cst_115 : f32 to vector<1x256xf32>
    %104 = arith.addf %101, %103 : vector<1x256xf32>
    %105 = math.rsqrt %104 : vector<1x256xf32>
    %106 = arith.mulf %102, %105 : vector<1x256xf32>
    %c0_116 = arith.constant 0 : index
    %c0_117 = arith.constant 0 : index
    %107 = vector.load %arg6[%c0_116, %c0_117] : memref<1x256xf32, #tpu.memory_space<vmem>>, vector<1x256xf32>
    %108 = arith.mulf %99, %106 : vector<1x256xf32>
    %109 = arith.subf %107, %108 : vector<1x256xf32>
    %110 = vector.broadcast %106 : vector<1x256xf32> to vector<32x256xf32>
    %111 = arith.mulf %82, %110 : vector<32x256xf32>
    %112 = vector.broadcast %109 : vector<1x256xf32> to vector<32x256xf32>
    %113 = arith.addf %111, %112 : vector<32x256xf32>
    %cst_118 = arith.constant 0.000000e+00 : f32
    %114 = vector.broadcast %cst_118 : f32 to vector<32x256xf32>
    %115 = arith.maximumf %113, %114 : vector<32x256xf32>
    %c0_119 = arith.constant 0 : index
    %c0_120 = arith.constant 0 : index
    %116 = vector.load %arg9[%c0_119, %c0_120] : memref<32x256xf32, #tpu.memory_space<vmem>>, vector<32x256xf32>
    tpu.vector_store %arg9[%c0_119, %c0_120], %115 {strides = array<i32>} : memref<32x256xf32, #tpu.memory_space<vmem>>, vector<32x256xf32>,
    return
  }
}

</mosaic_0001>

<bundles_post_ra>
// kernel: tpu_custom_call.1
= control target key start
LH: loop header
LB: loop body
LE: loop exit
PB: predicated region body
PF: predicated region fallthrough
CT: control target
= control target key end

     0   :  { %14 = vsyncpa [#allocation5], 0  ;;  %s3391_s0 = inlined_call_operand.vmem [shape: f32[2,16,64], index: 0, kind: input, shape index: {}]   ;;  %s3392_s1 = inlined_call_operand.hbm [shape: f32[5,64,128], index: 1, kind: input, shape index: {}]   ;;  %s3393_s2 = inlined_call_operand.hbm [shape: f32[5,128,128], index: 2, kind: input, shape index: {}]   ;;  %s3394_s3 = inlined_call_operand.vmem [shape: f32[128,256], index: 3, kind: input, shape index: {}]   ;;  %s3395_s4 = inlined_call_operand.vmem [shape: f32[1,256], index: 4, kind: input, shape index: {}]   ;;  %s3396_s5 = inlined_call_operand.vmem [shape: f32[1,256], index: 5, kind: input, shape index: {}]   ;;  %s3397_s6 = inlined_call_operand.vmem [shape: f32[1,256], index: 6, kind: input, shape index: {}]   ;;  %s3398_s7 = inlined_call_operand.vmem [shape: f32[256,16], index: 7, kind: input, shape index: {}]   ;;  %s3399_s8 = inlined_call_operand.hbm [shape: f32[16,256], index: 8, kind: input, shape index: {}]   ;;  %s3400_s9 = inlined_call_operand.hbm [shape: f32[32,256], index: 9, kind: output, shape index: {}]  }
   0x1   :  { %15 = vsyncpa [#allocation8], 0 }
   0x2   :  { %16 = vsyncpa [#allocation6], 0  ;;  %s2864_s30 = smov [#allocation7]   ;;  %s2865_s11 = smov [#allocation4]  }
   0x3   :  { %s36_s10 = sshll.u32 %s2864_s30, 4  ;;  %s24_s12 = sshll.u32 %s2865_s11, 4  ;;  %s37_s10 = int_to_ptr.vmem [resolvable:$true] %s36_s10  ;;  %s2924_s12 = int_to_ptr.vmem [resolvable:$true] %s24_s12 }
   0x4   :  { %s2770_s15 = scalar_lea.hbm %s3393_s2, 10240 }
   0x5   :  { %p2771_p0 = scmp.ne.s32.totalorder %s3393_s2, %s2770_s15  ;;  %p2774_p1 = scmp.lt.u32.totalorder %s2770_s15, %s3393_s2 }
   0x7   :  { %p2776_p2 = pnand %p2774_p1, %p2771_p0 }
   0x9   :  { %2779 = shalt.err (!%p2776_p2)
}
   0xa   :  { %s2780_s20 = scalar_lea.vmem %s37_s10, 10240  ;;  %p2785_p4 = scmp.lt.s32.totalorder %s37_s10, %s37_s10 }
   0xb   :  { %p2781_p3 = scmp.ne.s32.totalorder %s37_s10, %s2780_s20  ;;  %p2786_p5 = scmp.lt.s32.totalorder %s2780_s20, %s2780_s20 }
   0xd   :  { %p2787_p6 = por %p2786_p5, %p2785_p4 }
   0xf   :  { %p2788_p7 = pnand %p2787_p6, %p2781_p3 }
  0x11   :  { %2791 = shalt.err (!%p2788_p7)
}
  0x12   :  { %s2866_s21 = smov 128   ;;  %s2867_s22 = smov 8  }
  0x13   :  { %42 = dma.hbm_to_vmem [thread:$0]  %s3393_s2, 10240, %s37_s10, [#allocation8], %s2866_s21, %s2866_s21, %s2867_s22  }
  0x14   :  { %s2792_s27 = scalar_lea.hbm %s3392_s1, 5120 }
  0x15   :  { %p2793_p8 = scmp.ne.s32.totalorder %s3392_s1, %s2792_s27  ;;  %p2796_p9 = scmp.lt.u32.totalorder %s2792_s27, %s3392_s1 }
  0x17   :  { %p2798_p10 = pnand %p2796_p9, %p2793_p8 }
  0x19   :  { %2801 = shalt.err (!%p2798_p10)
}
  0x1a   :  { %s2802_s13 = scalar_lea.vmem %s2924_s12, 5120  ;;  %p2807_p12 = scmp.lt.s32.totalorder %s2924_s12, %s2924_s12 }
  0x1b   :  { %p2803_p11 = scmp.ne.s32.totalorder %s2924_s12, %s2802_s13  ;;  %p2808_p13 = scmp.lt.s32.totalorder %s2802_s13, %s2802_s13 }
  0x1d   :  { %p2809_p0 = por %p2808_p13, %p2807_p12 }
  0x1f   :  { %p2810_p1 = pnand %p2809_p0, %p2803_p11 }
  0x21   :  { %2813 = shalt.err (!%p2810_p1)
}
  0x22   :  { %30 = dma.hbm_to_vmem [thread:$0]  %s3392_s1, 5120, %s2924_s12, [#allocation5], %s2866_s21, %s2866_s21, %s2867_s22  }
  0x23   :  { %s2868_s14 = smov [#allocation9]   ;;  %s2814_s18 = scalar_lea.hbm %s3399_s8, 512 }
  0x24   :  { %s58_s15 = sshll.u32 %s2868_s14, 4  ;;  %p2815_p2 = scmp.ne.s32.totalorder %s3399_s8, %s2814_s18  ;;  %s59_s15 = int_to_ptr.vmem [resolvable:$true] %s58_s15 }
  0x25   :  { %p2818_p3 = scmp.lt.u32.totalorder %s2814_s18, %s3399_s8 }
  0x27   :  { %p2820_p4 = pnand %p2818_p3, %p2815_p2 }
  0x29   :  { %2823 = shalt.err (!%p2820_p4)
}
  0x2a   :  { %s2824_s25 = scalar_lea.vmem %s59_s15, 512  ;;  %p2829_p6 = scmp.lt.s32.totalorder %s59_s15, %s59_s15 }
  0x2b   :  { %p2825_p5 = scmp.ne.s32.totalorder %s59_s15, %s2824_s25  ;;  %p2830_p7 = scmp.lt.s32.totalorder %s2824_s25, %s2824_s25 }
  0x2d   :  { %p2831_p8 = por %p2830_p7, %p2829_p6 }
  0x2f   :  { %p2832_p9 = pnand %p2831_p8, %p2825_p5 }
  0x31   :  { %2835 = shalt.err (!%p2832_p9)
}
  0x32   :  { %s2869_s1 = smov 256   ;;  %s2870_s12 = smov 16  }
  0x33   :  { %64 = dma.hbm_to_vmem [thread:$0]  %s3399_s8, 512, %s59_s15, [#allocation8], %s2869_s1, %s2869_s1, %s2870_s12  }
  0x34   :  { %2858 = dma.done.wait [#allocation5], 5120  }
  0x35   :  { %2859 = vsyncadd [#allocation5], 4294962176 }
  0x36   :  { %2860 = dma.done.wait [#allocation8], 10752  }
  0x37   :  { %2861 = vsyncadd [#allocation8], 4294956544  ;;  %vm74_vm0 = vcmask 517120   ;;  %v2871_v0 = vmov 0.0   ;;  %v105_v1 = vld [vmem:[#allocation4 + $0x40] sm:$0xff]  ;;  %v106_v2 = vld [vmem:[#allocation4 + $0x48] sm:$0xff] }
  0x38   :  { %75 = vst.msk [vmem:[#allocation2] sm:$0x3] %vm74_vm0, %v2871_v0  ;;  %76 = vst.msk [vmem:[#allocation2 + $0x18] sm:$0x3] %vm74_vm0, %v2871_v0  ;;  %v107_v3 = vld [vmem:[#allocation4 + $0x50] sm:$0xff]  ;;  %vm83_vm1 = vcmask 523264   ;;  %v2380_v4 = vpack.c.bf16 %v106_v2, %v105_v1 }
  0x39   :  { %77 = vst.msk [vmem:[#allocation2 + $0x12] sm:$0x3] %vm74_vm0, %v2871_v0  ;;  %78 = vst.msk [vmem:[#allocation2 + $0x2a] sm:$0x3] %vm74_vm0, %v2871_v0  ;;  %v108_v5 = vld [vmem:[#allocation4 + $0x58] sm:$0xff]  ;;  %v109_v7 = vld [vmem:[#allocation4 + $0x60] sm:$0xff] }
  0x3a   :  { %653 = vst [vmem:[#allocation3] sm:$0x3] %v2871_v0  ;;  %654 = vst [vmem:[#allocation3 + $0x18] sm:$0x3] %v2871_v0  ;;  %v2384_v6 = vpack.c.bf16 %v108_v5, %v107_v3  ;;  %v110_v8 = vld [vmem:[#allocation4 + $0x68] sm:$0xff]  ;;  %v79_v9 = vld [vmem:[%s3391_s0] sm:$0xff]  ;;  %2381 = vmatprep.subr.bf16.mxu0 %v2380_v4 }
  0x3b   :  { %655 = vst [vmem:[#allocation3 + $0x12] sm:$0x3] %v2871_v0  ;;  %656 = vst [vmem:[#allocation3 + $0x2a] sm:$0x3] %v2871_v0  ;;  %v80_v10 = vld [vmem:[%s3391_s0 + $0x8] sm:$0xff]  ;;  %2383 = vmatpush3.bf16.msra.mxu0 %v2380_v4  ;;  %v2388_v11 = vpack.c.bf16 %v110_v8, %v109_v7  ;;  %v81_v12 = vld [vmem:[%s3391_s0 + $0x10] sm:$0xff] }
  0x3c   :  { %84 = vst.msk [vmem:[#allocation2 + $0x2] sm:$0xff] %vm83_vm1, %v79_v9  ;;  %85 = vst.msk [vmem:[#allocation2 + $0xa] sm:$0xff] %vm83_vm1, %v80_v10  ;;  %2385 = vmatprep.subr.bf16.mxu0 %v2384_v6  ;;  %v111_v13 = vld [vmem:[#allocation4 + $0x70] sm:$0xff]  ;;  %v112_v14 = vld [vmem:[#allocation4 + $0x78] sm:$0xff]  ;;  %vm1563_vm2 = vcmask 130048  }
  0x3d   :  { %86 = vst.msk [vmem:[#allocation2 + $0x1a] sm:$0xff] %vm83_vm1, %v81_v12  ;;  %v82_v15 = vld [vmem:[%s3391_s0 + $0x18] sm:$0xff]  ;;  %v2392_v16 = vpack.c.bf16 %v112_v14, %v111_v13  ;;  %v92_v18 = vld [vmem:[#allocation4] sm:$0xff]  ;;  %v93_v19 = vld [vmem:[#allocation4 + $0x8] sm:$0xff] }
  0x3e   :  { %87 = vst.msk [vmem:[#allocation2 + $0x22] sm:$0xff] %vm83_vm1, %v82_v15  ;;  %v2396_v20 = vpack.c.bf16 %v93_v19, %v92_v18  ;;  %v94_v21 = vld [vmem:[#allocation4 + $0x10] sm:$0xff]  ;;  %v95_v22 = vld [vmem:[#allocation4 + $0x18] sm:$0xff]  ;;  %v96_v26 = vld [vmem:[#allocation4 + $0x20] sm:$0xff] }
  0x3f   :  { %2387 = vmatpush3.bf16.msra.mxu0 %v2384_v6  ;;  %v2400_v24 = vpack.c.bf16 %v95_v22, %v94_v21  ;;  %v97_v27 = vld [vmem:[#allocation4 + $0x28] sm:$0xff]  ;;  %v98_v28 = vld [vmem:[#allocation4 + $0x30] sm:$0xff]  ;;  %v686_v32 = vld [vmem:[#allocation7 + $0x80] sm:$0xff] }
  0x40   :  { %2389 = vmatprep.subr.bf16.mxu0 %v2388_v11  ;;  %v2404_v30 = vpack.c.bf16 %v97_v27, %v96_v26  ;;  %v687_v33 = vld [vmem:[#allocation7 + $0x88] sm:$0xff]  ;;  %v99_v34 = vld [vmem:[#allocation4 + $0x38] sm:$0xff]  ;;  %v688_v36 = vld [vmem:[#allocation7 + $0x90] sm:$0xff] }
  0x41   :  { %v2460_v35 = vpack.c.bf16 %v687_v33, %v686_v32  ;;  %v689_v37 = vld [vmem:[#allocation7 + $0x98] sm:$0xff]  ;;  %v690_v39 = vld [vmem:[#allocation7 + $0xa0] sm:$0xff]  ;;  %v691_v40 = vld [vmem:[#allocation7 + $0xa8] sm:$0xff]  ;;  %v2408_v41 = vpack.c.bf16 %v99_v34, %v98_v28 }
  0x42   :  { %v2464_v38 = vpack.c.bf16 %v689_v37, %v688_v36  ;;  %v312_v42 = vld [vmem:[#allocation4 + $0x80] sm:$0xff]  ;;  %v313_v43 = vld [vmem:[#allocation4 + $0x88] sm:$0xff]  ;;  %v2468_v44 = vpack.c.bf16 %v691_v40, %v690_v39  ;;  %v692_v45 = vld [vmem:[#allocation7 + $0xb0] sm:$0xff] }
  0x43   :  { %v100_v17 = vld [vmem:[#allocation2 + $0x1] sm:$0xff]  ;;  %2391 = vmatpush3.bf16.msra.mxu0 %v2388_v11  ;;  %v101_v23 = vld [vmem:[#allocation2 + $0x9] sm:$0xff]  ;;  %2461 = vmatprep.subr.bf16.mxu1 %v2460_v35  ;;  %v693_v46 = vld [vmem:[#allocation7 + $0xb8] sm:$0xff]  ;;  %v2412_v47 = vpack.c.bf16 %v313_v43, %v312_v42 }
  0x44   :  { %2096 = vmatprep.mubr.msk.f32.mxu0 %vm83_vm1, %v100_v17  ;;  %2393 = vmatprep.subr.bf16.mxu0 %v2392_v16  ;;  %v102_v25 = vld [vmem:[#allocation2 + $0x19] sm:$0xff]  ;;  %v314_v48 = vld [vmem:[#allocation4 + $0x90] sm:$0xff]  ;;  %v2472_v50 = vpack.c.bf16 %v693_v46, %v692_v45  ;;  %v89_v51 = vld [vmem:[#allocation2 + $0x8] sm:$0xff] }
  0x45   :  { %v103_v29 = vld [vmem:[#allocation2 + $0x21] sm:$0xff]  ;;  %2463 = vmatpush3.bf16.msra.mxu1 %v2460_v35  ;;  %v315_v49 = vld [vmem:[#allocation4 + $0x98] sm:$0xff]  ;;  %v318_v62 = vld [vmem:[#allocation4 + $0xb0] sm:$0xff] }
  0x46   :  { %v88_v31 = vld [vmem:[#allocation2] sm:$0xff]  ;;  %2465 = vmatprep.subr.bf16.mxu1 %v2464_v38  ;;  %v695_v53 = vld [vmem:[#allocation7 + $0xc8] sm:$0xff]  ;;  %v2416_v54 = vpack.c.bf16 %v315_v49, %v314_v48  ;;  %v90_v55 = vld [vmem:[#allocation2 + $0x18] sm:$0xff] }
  0x47   :  { %2395 = vmatpush3.bf16.msra.mxu0 %v2392_v16  ;;  %v694_v52 = vld [vmem:[#allocation7 + $0xc0] sm:$0xff]  ;;  %v317_v57 = vld [vmem:[#allocation4 + $0xa8] sm:$0xff]  ;;  %v319_v63 = vld [vmem:[#allocation4 + $0xb8] sm:$0xff] }
  0x48   :  { %2397 = vmatprep.subr.bf16.mxu0 %v2396_v20  ;;  %v316_v56 = vld [vmem:[#allocation4 + $0xa0] sm:$0xff]  ;;  %v2476_v58 = vpack.c.bf16 %v695_v53, %v694_v52  ;;  %v2424_v1 = vpack.c.bf16 %v319_v63, %v318_v62  ;;  %v427_v3 = vld [vmem:[#allocation4 + $0xc8] sm:$0xff]  ;;  %v428_v5 = vld [vmem:[#allocation4 + $0xd0] sm:$0xff] }
  0x49   :  { %2467 = vmatpush3.bf16.msra.mxu1 %v2464_v38  ;;  %v91_v59 = vld [vmem:[#allocation2 + $0x20] sm:$0xff]  ;;  %v2420_v60 = vpack.c.bf16 %v317_v57, %v316_v56  ;;  %v429_v6 = vld [vmem:[#allocation4 + $0xd8] sm:$0xff]  ;;  %v308_v7 = vld [vmem:[#allocation2 + $0xa] sm:$0xff] }
  0x4a   :  { %2097 = vmatmul.mubr.msk.f32.vlgmr.msra.gmra.mrb[0].mxu0 %vm83_vm1, %v101_v23  ;;  %2469 = vmatprep.subr.bf16.mxu1 %v2468_v44  ;;  %v307_v61 = vld [vmem:[#allocation2 + $0x2] sm:$0xff]  ;;  %v2432_v8 = vpack.c.bf16 %v429_v6, %v428_v5  ;;  %v309_v9 = vld [vmem:[#allocation2 + $0x1a] sm:$0xff]  ;;  %v432_v15 = vld [vmem:[#allocation4 + $0xf0] sm:$0xff] }
  0x4b   :  { %2399 = vmatpush3.bf16.msra.mxu0 %v2396_v20  ;;  %2099 = vmatprep.mubr.msk.f32.mxu0 %vm83_vm1, %v102_v25  ;;  %v426_v2 = vld [vmem:[#allocation4 + $0xc0] sm:$0xff]  ;;  %v431_v11 = vld [vmem:[#allocation4 + $0xe8] sm:$0xff]  ;;  %v433_v16 = vld [vmem:[#allocation4 + $0xf8] sm:$0xff] }
  0x4c   :  { %2401 = vmatprep.subr.bf16.mxu0 %v2400_v24  ;;  %v2428_v4 = vpack.c.bf16 %v427_v3, %v426_v2  ;;  %v430_v10 = vld [vmem:[#allocation4 + $0xe0] sm:$0xff]  ;;  %v2440_v17 = vpack.c.bf16 %v433_v16, %v432_v15  ;;  %v541_v19 = vld [vmem:[#allocation4 + $0x108] sm:$0xff]  ;;  %v542_v21 = vld [vmem:[#allocation4 + $0x110] sm:$0xff] }
  0x4d   :  { %2471 = vmatpush3.bf16.msra.mxu1 %v2468_v44  ;;  %v310_v12 = vld [vmem:[#allocation2 + $0x22] sm:$0xff]  ;;  %v2436_v13 = vpack.c.bf16 %v431_v11, %v430_v10  ;;  %v543_v22 = vld [vmem:[#allocation4 + $0x118] sm:$0xff]  ;;  %v422_v23 = vld [vmem:[#allocation2 + $0xb] sm:$0xff] }
  0x4e   :  { %2100 = vmatmul.mubr.msk.f32.gmra.mrb[2].mxu0 %vm83_vm1, %v103_v29  ;;  %2473 = vmatprep.subr.bf16.mxu1 %v2472_v50  ;;  %v421_v14 = vld [vmem:[#allocation2 + $0x3] sm:$0xff]  ;;  %v423_v25 = vld [vmem:[#allocation2 + $0x1b] sm:$0xff]  ;;  %v536_v34 = vld [vmem:[#allocation2 + $0xc] sm:$0xff] }
  0x4f   :  { %2403 = vmatpush3.bf16.msra.mxu0 %v2400_v24  ;;  %2118 = vmatprep.mubr.msk.f32.mxu0 %vm83_vm1, %v88_v31  ;;  %v540_v18 = vld [vmem:[#allocation4 + $0x100] sm:$0xff]  ;;  %v2448_v24 = vpack.c.bf16 %v543_v22, %v542_v21  ;;  %v545_v27 = vld [vmem:[#allocation4 + $0x128] sm:$0xff]  ;;  %v546_v31 = vld [vmem:[#allocation4 + $0x130] sm:$0xff] }
  0x50   :  { %2405 = vmatprep.subr.bf16.mxu0 %v2404_v30  ;;  %v2444_v20 = vpack.c.bf16 %v541_v19, %v540_v18  ;;  %v544_v26 = vld [vmem:[#allocation4 + $0x120] sm:$0xff]  ;;  %v547_v32 = vld [vmem:[#allocation4 + $0x138] sm:$0xff]  ;;  %v696_v37 = vld [vmem:[#allocation7 + $0xd0] sm:$0xff] }
  0x51   :  { %2475 = vmatpush3.bf16.msra.mxu1 %v2472_v50  ;;  %v424_v28 = vld [vmem:[#allocation2 + $0x23] sm:$0xff]  ;;  %v2452_v29 = vpack.c.bf16 %v545_v27, %v544_v26  ;;  %v2456_v33 = vpack.c.bf16 %v547_v32, %v546_v31  ;;  %v697_v38 = vld [vmem:[#allocation7 + $0xd8] sm:$0xff]  ;;  %v700_v43 = vld [vmem:[#allocation7 + $0xf0] sm:$0xff] }
  0x52   :  { %2477 = vmatprep.subr.bf16.mxu1 %v2476_v58  ;;  %v537_v35 = vld [vmem:[#allocation2 + $0x1c] sm:$0xff]  ;;  %v538_v36 = vld [vmem:[#allocation2 + $0x24] sm:$0xff]  ;;  %v2480_v39 = vpack.c.bf16 %v697_v38, %v696_v37  ;;  %v667_v57 = vld [vmem:[#allocation7 + $0x10] sm:$0xff] }
  0x53   :  { %2407 = vmatpush3.bf16.msra.mxu0 %v2404_v30  ;;  %v535_v30 = vld [vmem:[#allocation2 + $0x4] sm:$0xff]  ;;  %v701_v44 = vld [vmem:[#allocation7 + $0xf8] sm:$0xff]  ;;  %v671_v5 = vld [vmem:[#allocation7 + $0x30] sm:$0xff] }
  0x54   :  { %2409 = vmatprep.subr.bf16.mxu0 %v2408_v41  ;;  %v698_v40 = vld [vmem:[#allocation7 + $0xe0] sm:$0xff]  ;;  %v2488_v45 = vpack.c.bf16 %v701_v44, %v700_v43  ;;  %v670_v63 = vld [vmem:[#allocation7 + $0x28] sm:$0xff]  ;;  %v672_v6 = vld [vmem:[#allocation7 + $0x38] sm:$0xff] }
  0x55   :  { %2479 = vmatpush3.bf16.msra.mxu1 %v2476_v58  ;;  %v665_v46 = vld [vmem:[#allocation7] sm:$0xff]  ;;  %v668_v58 = vld [vmem:[#allocation7 + $0x18] sm:$0xff]  ;;  %v1208_v11 = vld [vmem:[%s3394_s3 + $0x10] sm:$0xff] }
  0x56   :  { %2481 = vmatprep.subr.bf16.mxu1 %v2480_v39  ;;  %v669_v62 = vld [vmem:[#allocation7 + $0x20] sm:$0xff]  ;;  %v1212_v18 = vld [vmem:[%s3394_s3 + $0x30] sm:$0xff]  ;;  %v1215_v19 = vld [vmem:[%s3394_s3 + $0x48] sm:$0xff] }
  0x57   :  { %2411 = vmatpush3.bf16.msra.mxu0 %v2408_v41  ;;  %v699_v41 = vld [vmem:[#allocation7 + $0xe8] sm:$0xff]  ;;  %v2500_v3 = vpack.c.bf16 %v670_v63, %v669_v62  ;;  %v1217_v22 = vld [vmem:[%s3394_s3 + $0x58] sm:$0xff]  ;;  %v1216_v26 = vld [vmem:[%s3394_s3 + $0x50] sm:$0xff] }
  0x58   :  { %2413 = vmatprep.subr.bf16.mxu0 %v2412_v47  ;;  %v2484_v42 = vpack.c.bf16 %v699_v41, %v698_v40  ;;  %v674_v21 = vld [vmem:[#allocation7 + $0x48] sm:$0xff]  ;;  %v676_v31 = vld [vmem:[#allocation7 + $0x58] sm:$0xff]  ;;  %v1222_v43 = vld [vmem:[%s3394_s3 + $0x80] sm:$0xff] }
  0x59   :  { %2483 = vmatpush3.bf16.msra.mxu1 %v2480_v39  ;;  %v1223_v37 = vld [vmem:[%s3394_s3 + $0x88] sm:$0xff]  ;;  %v1225_v38 = vld [vmem:[%s3394_s3 + $0x98] sm:$0xff]  ;;  %v677_v39 = vld [vmem:[#allocation7 + $0x60] sm:$0xff] }
  0x5a   :  { %2119 = vmatmul.mubr.msk.f32.vlgmr.msra.gmra.mrb[0].mxu0 %vm83_vm1, %v89_v51  ;;  %2485 = vmatprep.subr.bf16.mxu1 %v2484_v42  ;;  %v678_v40 = vld [vmem:[#allocation7 + $0x68] sm:$0xff]  ;;  %v1224_v44 = vld [vmem:[%s3394_s3 + $0x90] sm:$0xff] }
  0x5b   :  { %2415 = vmatpush3.bf16.msra.mxu0 %v2412_v47  ;;  %2121 = vmatprep.mubr.msk.f32.mxu0 %vm83_vm1, %v90_v55  ;;  %v666_v47 = vld [vmem:[#allocation7 + $0x8] sm:$0xff] }
  0x5c   :  { %2417 = vmatprep.subr.bf16.mxu0 %v2416_v54  ;;  %v2492_v48 = vpack.c.bf16 %v666_v47, %v665_v46  ;;  %v1227_v46 = vld [vmem:[%s3394_s3 + $0xa8] sm:$0xff]  ;;  %v1229_v47 = vld [vmem:[%s3394_s3 + $0xb8] sm:$0xff] }
  0x5d   :  { %2487 = vmatpush3.bf16.msra.mxu1 %v2484_v42  ;;  %v2636_v42 = vpack.c.bf16 %v1225_v38, %v1223_v37  ;;  %v1231_v63 = vld [vmem:[%s3394_s3 + $0xc8] sm:$0xff]  ;;  %v991_v38 = vld [vmem:[#allocation7 + $0x1a0] sm:$0xff] }
  0x5e   :  { %2122 = vmatmul.mubr.msk.f32.gmra.mrb[2].mxu0 %vm83_vm1, %v91_v59  ;;  %2489 = vmatprep.subr.bf16.mxu1 %v2488_v45 }
  0x5f   :  { %2419 = vmatpush3.bf16.msra.mxu0 %v2416_v54  ;;  %2140 = vmatprep.mubr.msk.f32.mxu0 %vm83_vm1, %v307_v61  ;;  %v2496_v61 = vpack.c.bf16 %v668_v58, %v667_v57  ;;  %v680_v57 = vld [vmem:[#allocation7 + $0x78] sm:$0xff]  ;;  %v2638_v58 = vpack.c.bf16 %v1224_v44, %v1222_v43 }
  0x60   :  { %2421 = vmatprep.subr.bf16.mxu0 %v2420_v60 }
  0x61   :  { %2491 = vmatpush3.bf16.msra.mxu1 %v2488_v45  ;;  %v2516_v45 = vpack.c.bf16 %v678_v40, %v677_v39  ;;  %v992_v39 = vld [vmem:[#allocation7 + $0x1a8] sm:$0xff] }
  0x62   :  { %2493 = vmatprep.subr.bf16.mxu1 %v2492_v48  ;;  %v2564_v40 = vpack.c.bf16 %v992_v39, %v991_v38 }
  0x63   :  { %2423 = vmatpush3.bf16.msra.mxu0 %v2420_v60 }
  0x64   :  { %2425 = vmatprep.subr.bf16.mxu0 %v2424_v1 }
  0x67   :  { %2427 = vmatpush3.bf16.msra.mxu0 %v2424_v1 }
  0x68   :  { %2429 = vmatprep.subr.bf16.mxu0 %v2428_v4 }
  0x6a   :  { %2141 = vmatmul.mubr.msk.f32.vlgmr.msra.gmra.mrb[0].mxu0 %vm83_vm1, %v308_v7  ;;  %v1207_v7 = vld [vmem:[%s3394_s3 + $0x8] sm:$0xff] }
  0x6b   :  { %2431 = vmatpush3.bf16.msra.mxu0 %v2428_v4  ;;  %2143 = vmatprep.mubr.msk.f32.mxu0 %vm83_vm1, %v309_v9  ;;  %v1206_v9 = vld [vmem:[%s3394_s3] sm:$0xff] }
  0x6c   :  { %2433 = vmatprep.subr.bf16.mxu0 %v2432_v8  ;;  %v2622_v15 = vpack.c.bf16 %v1208_v11, %v1206_v9  ;;  %v879_v9 = vld [vmem:[#allocation7 + $0x110] sm:$0xff] }
  0x6e   :  { %2144 = vmatmul.mubr.msk.f32.gmra.mrb[2].mxu0 %vm83_vm1, %v310_v12  ;;  %v1211_v12 = vld [vmem:[%s3394_s3 + $0x28] sm:$0xff] }
  0x6f   :  { %2435 = vmatpush3.bf16.msra.mxu0 %v2432_v8  ;;  %2162 = vmatprep.mubr.msk.f32.mxu0 %vm83_vm1, %v421_v14  ;;  %v1209_v8 = vld [vmem:[%s3394_s3 + $0x18] sm:$0xff]  ;;  %v2504_v14 = vpack.c.bf16 %v672_v6, %v671_v5  ;;  %v1230_v6 = vld [vmem:[%s3394_s3 + $0xc0] sm:$0xff] }
  0x70   :  { %2437 = vmatprep.subr.bf16.mxu0 %v2436_v13  ;;  %v2620_v10 = vpack.c.bf16 %v1209_v8, %v1207_v7  ;;  %v1232_v7 = vld [vmem:[%s3394_s3 + $0xd0] sm:$0xff] }
  0x71   :  { %v2646_v11 = vpack.c.bf16 %v1232_v7, %v1230_v6 }
  0x73   :  { %2439 = vmatpush3.bf16.msra.mxu0 %v2436_v13  ;;  %v1213_v13 = vld [vmem:[%s3394_s3 + $0x38] sm:$0xff] }
  0x74   :  { %2441 = vmatprep.subr.bf16.mxu0 %v2440_v17  ;;  %v2624_v16 = vpack.c.bf16 %v1213_v13, %v1211_v12 }
  0x77   :  { %2443 = vmatpush3.bf16.msra.mxu0 %v2440_v17  ;;  %v1210_v17 = vld [vmem:[%s3394_s3 + $0x20] sm:$0xff] }
  0x78   :  { %2445 = vmatprep.subr.bf16.mxu0 %v2444_v20 }
  0x7a   :  { %2163 = vmatmul.mubr.msk.f32.vlgmr.msra.gmra.mrb[0].mxu0 %vm83_vm1, %v422_v23  ;;  %v2626_v23 = vpack.c.bf16 %v1212_v18, %v1210_v17 }
  0x7b   :  { %2447 = vmatpush3.bf16.msra.mxu0 %v2444_v20  ;;  %2165 = vmatprep.mubr.msk.f32.mxu0 %vm83_vm1, %v423_v25  ;;  %v673_v20 = vld [vmem:[#allocation7 + $0x40] sm:$0xff] }
  0x7c   :  { %2449 = vmatprep.subr.bf16.mxu0 %v2448_v24  ;;  %v1214_v25 = vld [vmem:[%s3394_s3 + $0x40] sm:$0xff]  ;;  %v2508_v27 = vpack.c.bf16 %v674_v21, %v673_v20  ;;  %v884_v20 = vld [vmem:[#allocation7 + $0x138] sm:$0xff] }
  0x7d   :  { %v2630_v32 = vpack.c.bf16 %v1216_v26, %v1214_v25  ;;  %v887_v25 = vld [vmem:[#allocation7 + $0x150] sm:$0xff]  ;;  %v888_v26 = vld [vmem:[#allocation7 + $0x158] sm:$0xff] }
  0x7e   :  { %2166 = vmatmul.mubr.msk.f32.gmra.mrb[2].mxu0 %vm83_vm1, %v424_v28  ;;  %v1219_v28 = vld [vmem:[%s3394_s3 + $0x68] sm:$0xff] }
  0x7f   :  { %2451 = vmatpush3.bf16.msra.mxu0 %v2448_v24  ;;  %2184 = vmatprep.mubr.msk.f32.mxu0 %vm83_vm1, %v535_v30  ;;  %v2628_v24 = vpack.c.bf16 %v1217_v22, %v1215_v19  ;;  %v675_v30 = vld [vmem:[#allocation7 + $0x50] sm:$0xff]  ;;  %v885_v22 = vld [vmem:[#allocation7 + $0x140] sm:$0xff] }
  0x80   :  { %2453 = vmatprep.subr.bf16.mxu0 %v2452_v29  ;;  %v883_v19 = vld [vmem:[#allocation7 + $0x130] sm:$0xff] }
  0x81   :  { %v2536_v21 = vpack.c.bf16 %v884_v20, %v883_v19  ;;  %v1110_v19 = vld [vmem:[#allocation7 + $0x268] sm:$0xff] }
  0x83   :  { %2455 = vmatpush3.bf16.msra.mxu0 %v2452_v29  ;;  %v1221_v29 = vld [vmem:[%s3394_s3 + $0x78] sm:$0xff] }
  0x84   :  { %2457 = vmatprep.subr.bf16.mxu0 %v2456_v33 }
  0x87   :  { %2459 = vmatpush3.bf16.msra.mxu0 %v2456_v33  ;;  %v2632_v33 = vpack.c.bf16 %v1221_v29, %v1219_v28  ;;  %v889_v28 = vld [vmem:[#allocation7 + $0x160] sm:$0xff]  ;;  %v890_v29 = vld [vmem:[#allocation7 + $0x168] sm:$0xff] }
  0x88   :  { %2621 = vmatprep.subr.bf16.mxu0 %v2620_v10  ;;  %v880_v10 = vld [vmem:[#allocation7 + $0x118] sm:$0xff] }
  0x89   :  { %v2528_v12 = vpack.c.bf16 %v880_v10, %v879_v9  ;;  %v1104_v9 = vld [vmem:[#allocation7 + $0x238] sm:$0xff] }
  0x8a   :  { %2185 = vmatmul.mubr.msk.f32.vlgmr.msra.gmra.mrb[0].mxu0 %vm83_vm1, %v536_v34  ;;  %v1218_v34 = vld [vmem:[%s3394_s3 + $0x60] sm:$0xff] }
  0x8b   :  { %2187 = vmatprep.mubr.msk.f32.mxu0 %vm83_vm1, %v537_v35  ;;  %2623 = vmatpush1.bf16.msra.mxu0 %v2622_v15  ;;  %v1220_v35 = vld [vmem:[%s3394_s3 + $0x70] sm:$0xff]  ;;  %v882_v15 = vld [vmem:[#allocation7 + $0x128] sm:$0xff] }
  0x8c   :  { %2625 = vmatprep.subr.bf16.mxu0 %v2624_v16  ;;  %v2634_v41 = vpack.c.bf16 %v1220_v35, %v1218_v34  ;;  %v989_v35 = vld [vmem:[#allocation7 + $0x190] sm:$0xff] }
  0x8e   :  { %2188 = vmatmul.mubr.msk.f32.gmra.mrb[2].mxu0 %vm83_vm1, %v538_v36  ;;  %v2512_v36 = vpack.c.bf16 %v676_v31, %v675_v30  ;;  %v2548_v30 = vpack.c.bf16 %v890_v29, %v889_v28  ;;  %v891_v31 = vld [vmem:[#allocation7 + $0x170] sm:$0xff]  ;;  %v1237_v28 = vld [vmem:[%s3394_s3 + $0xf8] sm:$0xff] }
  0x8f   :  { %1314 = vmatprep.mubr.f32.mxu0 %v2871_v0  ;;  %2627 = vmatpush1.bf16.msra.mxu0 %v2626_v23  ;;  %v886_v23 = vld [vmem:[#allocation7 + $0x148] sm:$0xff] }
  0x90   :  { %2629 = vmatprep.subr.bf16.mxu0 %v2628_v24  ;;  %v2540_v24 = vpack.c.bf16 %v886_v23, %v885_v22  ;;  %v1112_v22 = vld [vmem:[#allocation7 + $0x278] sm:$0xff] }
  0x93   :  { %2631 = vmatpush1.bf16.msra.mxu0 %v2630_v32  ;;  %v987_v32 = vld [vmem:[#allocation7 + $0x180] sm:$0xff] }
  0x94   :  { %2633 = vmatprep.subr.bf16.mxu0 %v2632_v33  ;;  %v988_v33 = vld [vmem:[#allocation7 + $0x188] sm:$0xff] }
  0x95   :  { %v2556_v34 = vpack.c.bf16 %v988_v33, %v987_v32  ;;  %v1400_v32 = vld [vmem:[%s3398_s7 + $0x88] sm:$0xff] }
  0x97   :  { %2635 = vmatpush1.bf16.msra.mxu0 %v2634_v41  ;;  %v993_v41 = vld [vmem:[#allocation7 + $0x1b0] sm:$0xff] }
  0x98   :  { %2637 = vmatprep.subr.bf16.mxu0 %v2636_v42  ;;  %v994_v42 = vld [vmem:[#allocation7 + $0x1b8] sm:$0xff] }
  0x99   :  { %v2568_v44 = vpack.c.bf16 %v994_v42, %v993_v41 }
  0x9b   :  { %2639 = vmatpush1.bf16.msra.mxu0 %v2638_v58 }
 0x15d   :  { %v3015_v49 = vpop.f32.mrb[0].mxu0 }
 0x15e   :  { %v650_v50 = vmax.f32 %v3015_v49, 0.0  ;;  %v3018_v51 = vpop.f32.mrb[1].mxu0 }
 0x15f   :  { %v649_v52 = vmax.f32 %v3018_v51, 0.0  ;;  %v892_v51 = vld [vmem:[#allocation7 + $0x178] sm:$0xff] }
 0x160   :  { %658 = vst [vmem:[#allocation3 + $0xa] sm:$0xff] %v650_v50 }
 0x161   :  { %657 = vst [vmem:[#allocation3 + $0x2] sm:$0xff] %v649_v52  ;;  %v3025_v53 = vpop.f32.mrb[2].mxu0 }
 0x162   :  { %v652_v54 = vmax.f32 %v3025_v53, 0.0  ;;  %v3028_v55 = vpop.f32.mrb[3].mxu0 }
 0x163   :  { %v651_v56 = vmax.f32 %v3028_v55, 0.0  ;;  %v998_v55 = vld [vmem:[#allocation7 + $0x1d8] sm:$0xff] }
 0x164   :  { %660 = vst [vmem:[#allocation3 + $0x22] sm:$0xff] %v652_v54 }
 0x165   :  { %659 = vst [vmem:[#allocation3 + $0x1a] sm:$0xff] %v651_v56 }
 0x168   :  { %v681_v59 = vld [vmem:[#allocation3 + $0x1] sm:$0xff]  ;;  %v682_v60 = vld [vmem:[#allocation3 + $0x9] sm:$0xff] }
 0x169   :  { %2222 = vmatprep.mubr.f32.mxu1 %v681_v59  ;;  %v661_v4 = vld [vmem:[#allocation3] sm:$0xff]  ;;  %v2640_v59 = vpack.c.bf16 %v1229_v47, %v1227_v46  ;;  %v662_v13 = vld [vmem:[#allocation3 + $0x8] sm:$0xff]  ;;  %v996_v46 = vld [vmem:[#allocation7 + $0x1c8] sm:$0xff] }
 0x16a   :  { %2223 = vmatmul.mubr.f32.vlgmr.msra.gmra.mrb[0].mxu1 %v682_v60  ;;  %v1226_v60 = vld [vmem:[%s3394_s3 + $0xa0] sm:$0xff]  ;;  %v982_v43 = vld [vmem:[#allocation3 + $0x3] sm:$0xff] }
 0x16b   :  { %2495 = vmatpush3.bf16.msra.mxu1 %v2492_v48  ;;  %v679_v48 = vld [vmem:[#allocation7 + $0x70] sm:$0xff]  ;;  %2641 = vmatprep.subr.bf16.mxu0 %v2640_v59  ;;  %v999_v47 = vld [vmem:[#allocation7 + $0x1e0] sm:$0xff] }
 0x16c   :  { %v683_v1 = vld [vmem:[#allocation3 + $0x19] sm:$0xff]  ;;  %2497 = vmatprep.subr.bf16.mxu1 %v2496_v61  ;;  %v684_v2 = vld [vmem:[#allocation3 + $0x21] sm:$0xff]  ;;  %v2520_v62 = vpack.c.bf16 %v680_v57, %v679_v48  ;;  %v1097_v59 = vld [vmem:[#allocation7 + $0x200] sm:$0xff] }
 0x16d   :  { %2225 = vmatprep.mubr.f32.mxu1 %v683_v1  ;;  %v1233_v1 = vld [vmem:[%s3394_s3 + $0xd8] sm:$0xff]  ;;  %v663_v16 = vld [vmem:[#allocation3 + $0x18] sm:$0xff]  ;;  %v664_v18 = vld [vmem:[#allocation3 + $0x20] sm:$0xff] }
 0x16e   :  { %2226 = vmatmul.mubr.f32.gmra.mrb[2].mxu1 %v684_v2  ;;  %v877_v2 = vld [vmem:[#allocation7 + $0x100] sm:$0xff]  ;;  %v2644_v5 = vpack.c.bf16 %v1233_v1, %v1231_v63  ;;  %v1000_v48 = vld [vmem:[#allocation7 + $0x1e8] sm:$0xff]  ;;  %v1002_v57 = vld [vmem:[#allocation7 + $0x1f8] sm:$0xff] }
 0x16f   :  { %2499 = vmatpush3.bf16.msra.mxu1 %v2496_v61  ;;  %2260 = vmatprep.mubr.f32.mxu1 %v661_v4  ;;  %v1228_v61 = vld [vmem:[%s3394_s3 + $0xb0] sm:$0xff]  ;;  %v2580_v53 = vpack.c.bf16 %v1000_v48, %v999_v47  ;;  %v1100_v63 = vld [vmem:[#allocation7 + $0x218] sm:$0xff]  ;;  %v1403_v47 = vld [vmem:[%s3398_s7 + $0xa0] sm:$0xff] }
 0x170   :  { %2501 = vmatprep.subr.bf16.mxu1 %v2500_v3  ;;  %v2642_v4 = vpack.c.bf16 %v1228_v61, %v1226_v60  ;;  %v1098_v60 = vld [vmem:[#allocation7 + $0x208] sm:$0xff]  ;;  %v985_v7 = vld [vmem:[#allocation3 + $0x23] sm:$0xff] }
 0x171   :  { %v2588_v61 = vpack.c.bf16 %v1098_v60, %v1097_v59  ;;  %v1092_v10 = vld [vmem:[#allocation3 + $0x4] sm:$0xff]  ;;  %v1404_v48 = vld [vmem:[%s3398_s7 + $0xa8] sm:$0xff] }
 0x172   :  { %2643 = vmatpush1.bf16.msra.mxu0 %v2642_v4  ;;  %v1102_v4 = vld [vmem:[#allocation7 + $0x228] sm:$0xff]  ;;  %v1405_v59 = vld [vmem:[%s3398_s7 + $0xb0] sm:$0xff]  ;;  %v1406_v60 = vld [vmem:[%s3398_s7 + $0xb8] sm:$0xff] }
 0x173   :  { %2503 = vmatpush3.bf16.msra.mxu1 %v2500_v3  ;;  %v878_v3 = vld [vmem:[#allocation7 + $0x108] sm:$0xff]  ;;  %2645 = vmatprep.subr.bf16.mxu0 %v2644_v5 }
 0x174   :  { %2505 = vmatprep.subr.bf16.mxu1 %v2504_v14  ;;  %v2524_v8 = vpack.c.bf16 %v878_v3, %v877_v2  ;;  %v983_v2 = vld [vmem:[#allocation3 + $0xb] sm:$0xff]  ;;  %v984_v5 = vld [vmem:[#allocation3 + $0x1b] sm:$0xff] }
 0x175   :  { %v1101_v3 = vld [vmem:[#allocation7 + $0x220] sm:$0xff] }
 0x176   :  { %2647 = vmatpush1.bf16.msra.mxu0 %v2646_v11  ;;  %v2596_v6 = vpack.c.bf16 %v1102_v4, %v1101_v3  ;;  %v1408_v3 = vld [vmem:[%s3398_s7 + $0xc8] sm:$0xff] }
 0x177   :  { %2507 = vmatpush3.bf16.msra.mxu1 %v2504_v14  ;;  %v881_v14 = vld [vmem:[#allocation7 + $0x120] sm:$0xff] }
 0x178   :  { %2509 = vmatprep.subr.bf16.mxu1 %v2508_v27  ;;  %v2532_v17 = vpack.c.bf16 %v882_v15, %v881_v14  ;;  %v1107_v15 = vld [vmem:[#allocation7 + $0x250] sm:$0xff] }
 0x17b   :  { %2511 = vmatpush3.bf16.msra.mxu1 %v2508_v27  ;;  %v2544_v27 = vpack.c.bf16 %v888_v26, %v887_v25  ;;  %v1094_v25 = vld [vmem:[#allocation3 + $0x1c] sm:$0xff]  ;;  %v1095_v26 = vld [vmem:[#allocation3 + $0x24] sm:$0xff] }
 0x17c   :  { %2513 = vmatprep.subr.bf16.mxu1 %v2512_v36 }
 0x17f   :  { %2515 = vmatpush3.bf16.msra.mxu1 %v2512_v36  ;;  %v990_v36 = vld [vmem:[#allocation7 + $0x198] sm:$0xff] }
 0x180   :  { %2517 = vmatprep.subr.bf16.mxu1 %v2516_v45  ;;  %v2560_v37 = vpack.c.bf16 %v990_v36, %v989_v35  ;;  %v1384_v35 = vld [vmem:[%s3398_s7 + $0x8] sm:$0xff] }
 0x183   :  { %2519 = vmatpush3.bf16.msra.mxu1 %v2516_v45  ;;  %v995_v45 = vld [vmem:[#allocation7 + $0x1c0] sm:$0xff] }
 0x184   :  { %2521 = vmatprep.subr.bf16.mxu1 %v2520_v62  ;;  %v2572_v49 = vpack.c.bf16 %v996_v46, %v995_v45  ;;  %v1401_v45 = vld [vmem:[%s3398_s7 + $0x90] sm:$0xff]  ;;  %v1402_v46 = vld [vmem:[%s3398_s7 + $0x98] sm:$0xff] }
 0x187   :  { %2523 = vmatpush3.bf16.msra.mxu1 %v2520_v62  ;;  %v1099_v62 = vld [vmem:[#allocation7 + $0x210] sm:$0xff] }
 0x188   :  { %2525 = vmatprep.subr.bf16.mxu1 %v2524_v8  ;;  %v2592_v1 = vpack.c.bf16 %v1100_v63, %v1099_v62  ;;  %v1389_v62 = vld [vmem:[%s3398_s7 + $0x30] sm:$0xff]  ;;  %v1390_v63 = vld [vmem:[%s3398_s7 + $0x38] sm:$0xff] }
 0x18a   :  { %2261 = vmatmul.mubr.f32.vlgmr.msra.gmra.mrb[0].mxu1 %v662_v13  ;;  %v1106_v13 = vld [vmem:[#allocation7 + $0x248] sm:$0xff] }
 0x18b   :  { %2263 = vmatprep.mubr.f32.mxu1 %v663_v16  ;;  %2527 = vmatpush3.bf16.msra.mxu1 %v2524_v8  ;;  %v1103_v8 = vld [vmem:[#allocation7 + $0x230] sm:$0xff]  ;;  %v1108_v16 = vld [vmem:[#allocation7 + $0x258] sm:$0xff] }
 0x18c   :  { %2529 = vmatprep.subr.bf16.mxu1 %v2528_v12  ;;  %v2600_v11 = vpack.c.bf16 %v1104_v9, %v1103_v8  ;;  %v1409_v8 = vld [vmem:[%s3398_s7 + $0xd0] sm:$0xff]  ;;  %v1410_v9 = vld [vmem:[%s3398_s7 + $0xd8] sm:$0xff] }
 0x18e   :  { %2264 = vmatmul.mubr.f32.gmra.mrb[2].mxu1 %v664_v18  ;;  %v1109_v18 = vld [vmem:[#allocation7 + $0x260] sm:$0xff] }
 0x18f   :  { %2531 = vmatpush3.bf16.msra.mxu1 %v2528_v12  ;;  %2298 = vmatprep.mubr.f32.mxu1 %v649_v52  ;;  %v2552_v52 = vpack.c.bf16 %v892_v51, %v891_v31  ;;  %v1105_v12 = vld [vmem:[#allocation7 + $0x240] sm:$0xff]  ;;  %v2612_v20 = vpack.c.bf16 %v1110_v19, %v1109_v18  ;;  %v1236_v31 = vld [vmem:[%s3394_s3 + $0xf0] sm:$0xff]  ;;  %v1396_v18 = vld [vmem:[%s3398_s7 + $0x68] sm:$0xff] }
 0x190   :  { %2533 = vmatprep.subr.bf16.mxu1 %v2532_v17  ;;  %v2604_v14 = vpack.c.bf16 %v1106_v13, %v1105_v12  ;;  %v1394_v12 = vld [vmem:[%s3398_s7 + $0x58] sm:$0xff] }
 0x193   :  { %2535 = vmatpush3.bf16.msra.mxu1 %v2532_v17  ;;  %v2608_v17 = vpack.c.bf16 %v1108_v16, %v1107_v15  ;;  %v1412_v15 = vld [vmem:[%s3398_s7 + $0xe8] sm:$0xff] }
 0x194   :  { %2537 = vmatprep.subr.bf16.mxu1 %v2536_v21 }
 0x197   :  { %2539 = vmatpush3.bf16.msra.mxu1 %v2536_v21  ;;  %v1111_v21 = vld [vmem:[#allocation7 + $0x270] sm:$0xff] }
 0x198   :  { %2541 = vmatprep.subr.bf16.mxu1 %v2540_v24  ;;  %v2616_v23 = vpack.c.bf16 %v1112_v22, %v1111_v21  ;;  %v1414_v21 = vld [vmem:[%s3398_s7 + $0xf8] sm:$0xff] }
 0x19b   :  { %2543 = vmatpush3.bf16.msra.mxu1 %v2540_v24  ;;  %v1093_v24 = vld [vmem:[#allocation3 + $0xc] sm:$0xff] }
 0x19c   :  { %2545 = vmatprep.subr.bf16.mxu1 %v2544_v27 }
 0x19f   :  { %2547 = vmatpush3.bf16.msra.mxu1 %v2544_v27  ;;  %v1235_v27 = vld [vmem:[%s3394_s3 + $0xe8] sm:$0xff] }
 0x1a0   :  { %2549 = vmatprep.subr.bf16.mxu1 %v2548_v30  ;;  %v2648_v29 = vpack.c.bf16 %v1237_v28, %v1235_v27 }
 0x1a2   :  { %2649 = vmatprep.subr.bf16.mxu0 %v2648_v29 }
 0x1a3   :  { %2551 = vmatpush3.bf16.msra.mxu1 %v2548_v30  ;;  %v1234_v30 = vld [vmem:[%s3394_s3 + $0xe0] sm:$0xff] }
 0x1a4   :  { %2553 = vmatprep.subr.bf16.mxu1 %v2552_v52  ;;  %v2650_v51 = vpack.c.bf16 %v1236_v31, %v1234_v30  ;;  %v1238_v30 = vld [vmem:[%s3395_s4] sm:$0x3] }
 0x1a6   :  { %2651 = vmatpush1.bf16.msra.mxu0 %v2650_v51 }
 0x1a7   :  { %2555 = vmatpush3.bf16.msra.mxu1 %v2552_v52  ;;  %v1399_v52 = vld [vmem:[%s3398_s7 + $0x80] sm:$0xff] }
 0x1a8   :  { %2557 = vmatprep.subr.bf16.mxu1 %v2556_v34  ;;  %v3146_v33 = vpack.c.bf16 %v1400_v32, %v1399_v52 }
 0x1aa   :  { %2299 = vmatmul.mubr.f32.vlgmr.msra.gmra.mrb[0].mxu1 %v650_v50  ;;  %v997_v50 = vld [vmem:[#allocation7 + $0x1d0] sm:$0xff]  ;;  %2653 = vmatprep.subr.bf16.mxu0 %v3146_v33 }
 0x1ab   :  { %2301 = vmatprep.mubr.f32.mxu1 %v651_v56  ;;  %2559 = vmatpush3.bf16.msra.mxu1 %v2556_v34  ;;  %v2576_v56 = vpack.c.bf16 %v998_v55, %v997_v50  ;;  %v1383_v34 = vld [vmem:[%s3398_s7] sm:$0xff]  ;;  %v1385_v50 = vld [vmem:[%s3398_s7 + $0x10] sm:$0xff]  ;;  %v1386_v55 = vld [vmem:[%s3398_s7 + $0x18] sm:$0xff] }
 0x1ac   :  { %2561 = vmatprep.subr.bf16.mxu1 %v2560_v37  ;;  %v3155_v38 = vpack.c.bf16 %v1384_v35, %v1383_v34 }
 0x1ae   :  { %2302 = vmatmul.mubr.f32.gmra.mrb[2].mxu1 %v652_v54  ;;  %v1001_v54 = vld [vmem:[#allocation7 + $0x1f0] sm:$0xff] }
 0x1af   :  { %2563 = vmatpush3.bf16.msra.mxu1 %v2560_v37  ;;  %2336 = vmatprep.mubr.f32.mxu1 %v982_v43  ;;  %v2584_v58 = vpack.c.bf16 %v1002_v57, %v1001_v54  ;;  %v1387_v54 = vld [vmem:[%s3398_s7 + $0x20] sm:$0xff]  ;;  %v1388_v57 = vld [vmem:[%s3398_s7 + $0x28] sm:$0xff] }
 0x1b0   :  { %2565 = vmatprep.subr.bf16.mxu1 %v2564_v40 }
 0x1b3   :  { %2567 = vmatpush3.bf16.msra.mxu1 %v2564_v40 }
 0x1b4   :  { %2569 = vmatprep.subr.bf16.mxu1 %v2568_v44 }
 0x1b7   :  { %2571 = vmatpush3.bf16.msra.mxu1 %v2568_v44 }
 0x1b8   :  { %2573 = vmatprep.subr.bf16.mxu1 %v2572_v49 }
 0x1bb   :  { %2575 = vmatpush3.bf16.msra.mxu1 %v2572_v49  ;;  %v3167_v49 = vpack.c.bf16 %v1402_v46, %v1401_v45 }
 0x1bc   :  { %2577 = vmatprep.subr.bf16.mxu1 %v2576_v56 }
 0x1bf   :  { %2579 = vmatpush3.bf16.msra.mxu1 %v2576_v56  ;;  %v3175_v56 = vpack.c.bf16 %v1386_v55, %v1385_v50 }
 0x1c0   :  { %2581 = vmatprep.subr.bf16.mxu1 %v2580_v53 }
 0x1c3   :  { %2583 = vmatpush3.bf16.msra.mxu1 %v2580_v53  ;;  %v3185_v53 = vpack.c.bf16 %v1404_v48, %v1403_v47 }
 0x1c4   :  { %2585 = vmatprep.subr.bf16.mxu1 %v2584_v58 }
 0x1c7   :  { %2587 = vmatpush3.bf16.msra.mxu1 %v2584_v58  ;;  %v3193_v58 = vpack.c.bf16 %v1388_v57, %v1387_v54 }
 0x1c8   :  { %2589 = vmatprep.subr.bf16.mxu1 %v2588_v61 }
 0x1ca   :  { %2337 = vmatmul.mubr.f32.vlgmr.msra.gmra.mrb[0].mxu1 %v983_v2  ;;  %v1407_v2 = vld [vmem:[%s3398_s7 + $0xc0] sm:$0xff] }
 0x1cb   :  { %2339 = vmatprep.mubr.f32.mxu1 %v984_v5  ;;  %2591 = vmatpush3.bf16.msra.mxu1 %v2588_v61  ;;  %v3203_v61 = vpack.c.bf16 %v1406_v60, %v1405_v59  ;;  %v3221_v4 = vpack.c.bf16 %v1408_v3, %v1407_v2  ;;  %v1391_v5 = vld [vmem:[%s3398_s7 + $0x40] sm:$0xff] }
 0x1cc   :  { %2593 = vmatprep.subr.bf16.mxu1 %v2592_v1 }
 0x1ce   :  { %2340 = vmatmul.mubr.f32.gmra.mrb[2].mxu1 %v985_v7 }
 0x1cf   :  { %2595 = vmatpush3.bf16.msra.mxu1 %v2592_v1  ;;  %2374 = vmatprep.mubr.f32.mxu1 %v1092_v10  ;;  %v3211_v1 = vpack.c.bf16 %v1390_v63, %v1389_v62  ;;  %v3239_v10 = vpack.c.bf16 %v1410_v9, %v1409_v8 }
 0x1d0   :  { %2597 = vmatprep.subr.bf16.mxu1 %v2596_v6 }
 0x1d3   :  { %2599 = vmatpush3.bf16.msra.mxu1 %v2596_v6  ;;  %v1392_v6 = vld [vmem:[%s3398_s7 + $0x48] sm:$0xff] }
 0x1d4   :  { %2601 = vmatprep.subr.bf16.mxu1 %v2600_v11  ;;  %v3229_v7 = vpack.c.bf16 %v1392_v6, %v1391_v5 }
 0x1d7   :  { %2603 = vmatpush3.bf16.msra.mxu1 %v2600_v11  ;;  %v1393_v11 = vld [vmem:[%s3398_s7 + $0x50] sm:$0xff] }
 0x1d8   :  { %2605 = vmatprep.subr.bf16.mxu1 %v2604_v14  ;;  %v3247_v13 = vpack.c.bf16 %v1394_v12, %v1393_v11 }
 0x1db   :  { %2607 = vmatpush3.bf16.msra.mxu1 %v2604_v14  ;;  %v1411_v14 = vld [vmem:[%s3398_s7 + $0xe0] sm:$0xff] }
 0x1dc   :  { %2609 = vmatprep.subr.bf16.mxu1 %v2608_v17  ;;  %v3257_v16 = vpack.c.bf16 %v1412_v15, %v1411_v14 }
 0x1df   :  { %2611 = vmatpush3.bf16.msra.mxu1 %v2608_v17  ;;  %v1395_v17 = vld [vmem:[%s3398_s7 + $0x60] sm:$0xff] }
 0x1e0   :  { %2613 = vmatprep.subr.bf16.mxu1 %v2612_v20  ;;  %v3265_v19 = vpack.c.bf16 %v1396_v18, %v1395_v17 }
 0x1e3   :  { %2615 = vmatpush3.bf16.msra.mxu1 %v2612_v20  ;;  %v1413_v20 = vld [vmem:[%s3398_s7 + $0xf0] sm:$0xff] }
 0x1e4   :  { %2617 = vmatprep.subr.bf16.mxu1 %v2616_v23  ;;  %v3275_v22 = vpack.c.bf16 %v1414_v21, %v1413_v20 }
 0x1e7   :  { %2619 = vmatpush3.bf16.msra.mxu1 %v2616_v23  ;;  %v1397_v23 = vld [vmem:[%s3398_s7 + $0x70] sm:$0xff] }
 0x1ea   :  { %2375 = vmatmul.mubr.f32.vlgmr.msra.gmra.mrb[0].mxu1 %v1093_v24  ;;  %v1398_v24 = vld [vmem:[%s3398_s7 + $0x78] sm:$0xff] }
 0x1eb   :  { %2377 = vmatprep.mubr.f32.mxu1 %v1094_v25  ;;  %v3283_v25 = vpack.c.bf16 %v1398_v24, %v1397_v23 }
 0x1ee   :  { %2378 = vmatmul.mubr.f32.gmra.mrb[2].mxu1 %v1095_v26  ;;  %v1240_v26 = vlaneseq }
 0x1ef   :  { %1631 = vmatprep.mubr.f32.mxu1 %v2871_v0 }
 0x1f0   :  { %v3288_v27 = vshrl.u32 %v1240_v26, 7 }
 0x1f2   :  { %v3291_v29 = vsub.s32 1, %v3288_v27  ;;  %v3297_v31 = vsub.s32 0, %v3288_v27 }
 0x1f4   :  { %v1247_v52 = vrot.slane %v1238_v30, %v3291_v29 }
 0x2bd   :  { %v2376_v36 = vpop.f32.mrb[0].mxu1 }
 0x2be   :  { %v1179_v37 = vpop.f32.mrb[1].mxu1  ;;  %v1203_v42 = vmax.f32 %v2376_v36, 0.0 }
 0x2bf   :  { %v1202_v39 = vmax.f32 %v1179_v37, 0.0 }
 0x2c1   :  { %v2379_v40 = vpop.f32.mrb[2].mxu1  ;;  %1315 = vmatmul.mubr.f32.vlgmr.msra.gmra.mrb[4].mxu0 %v1202_v39 }
 0x2c2   :  { %v1189_v41 = vpop.f32.mrb[3].mxu1  ;;  %1320 = vmatprep.mubr.f32.mxu0 %v2871_v0  ;;  %2655 = vmatpush3.bf16.msra.mxu0 %v3155_v38  ;;  %v1205_v44 = vmax.f32 %v2379_v40, 0.0 }
 0x2c3   :  { %v1204_v43 = vmax.f32 %v1189_v41, 0.0  ;;  %2657 = vmatprep.subr.bf16.mxu0 %v3167_v49 }
 0x2c5   :  { %1321 = vmatmul.mubr.f32.gmra.mrb[6].mxu0 %v1203_v42 }
 0x2c6   :  { %1326 = vmatprep.mubr.f32.mxu0 %v2871_v0  ;;  %2659 = vmatpush3.bf16.msra.mxu0 %v3175_v56 }
 0x2c7   :  { %2661 = vmatprep.subr.bf16.mxu0 %v3185_v53 }
 0x2c9   :  { %1327 = vmatmul.mubr.f32.gmra.mrb[8].mxu0 %v1204_v43 }
 0x2ca   :  { %1332 = vmatprep.mubr.f32.mxu0 %v2871_v0  ;;  %2663 = vmatpush3.bf16.msra.mxu0 %v3193_v58 }
 0x2cb   :  { %2665 = vmatprep.subr.bf16.mxu0 %v3203_v61 }
 0x2cd   :  { %1333 = vmatmul.mubr.f32.gmra.mrb[10].mxu0 %v1205_v44 }
 0x2ce   :  { %2667 = vmatpush3.bf16.msra.mxu0 %v3211_v1 }
 0x2cf   :  { %2669 = vmatprep.subr.bf16.mxu0 %v3221_v4 }
 0x2d2   :  { %2671 = vmatpush3.bf16.msra.mxu0 %v3229_v7 }
 0x2d3   :  { %2673 = vmatprep.subr.bf16.mxu0 %v3239_v10 }
 0x2d6   :  { %2675 = vmatpush3.bf16.msra.mxu0 %v3247_v13 }
 0x2d7   :  { %2677 = vmatprep.subr.bf16.mxu0 %v3257_v16 }
 0x2da   :  { %2679 = vmatpush3.bf16.msra.mxu0 %v3265_v19 }
 0x2db   :  { %2681 = vmatprep.subr.bf16.mxu0 %v3275_v22 }
 0x2de   :  { %2683 = vmatpush3.bf16.msra.mxu0 %v3283_v25 }
 0x2df   :  { %2685 = vmatprep.subr.bf16.mxu0 %v3146_v33  ;;  %v1243_v33 = vrot.slane %v1238_v30, %v3297_v31 }
 0x394   :  { %v1316_v28 = vpop.f32.mrb[4].mxu0 }
 0x395   :  { %v1318_v51 = vpop.f32.mrb[5].mxu0  ;;  %v3307_v40 = vadd.f32 %v1316_v28, %v1243_v33 }
 0x396   :  { %v3305_v37 = vadd.f32 %v1318_v51, %v1247_v52 }
 0x398   :  { %v1322_v32 = vpop.f32.mrb[6].mxu0  ;;  %v1358_v46 = vmul.f32 %v3305_v37, %v3305_v37 }
 0x399   :  { %v1324_v34 = vpop.f32.mrb[7].mxu0  ;;  %v3303_v36 = vadd.f32 %v1322_v32, %v1243_v33 }
 0x39a   :  { %v3301_v35 = vadd.f32 %v1324_v34, %v1247_v52  ;;  %v1357_v34 = vmul.f32 %v3307_v40, %v3307_v40 }
 0x39b   :  { %v1339_v45 = vadd.f32 %v3303_v36, %v3307_v40 }
 0x39c   :  { %v1328_v39 = vpop.f32.mrb[8].mxu0  ;;  %v1360_v43 = vmul.f32 %v3301_v35, %v3301_v35  ;;  %v1348_v50 = vadd.f32 %v3301_v35, %v3305_v37 }
 0x39d   :  { %v3309_v41 = vadd.f32 %v1328_v39, %v1243_v33  ;;  %v1330_v42 = vpop.f32.mrb[9].mxu0 }
 0x39e   :  { %v3313_v44 = vadd.f32 %v1330_v42, %v1247_v52  ;;  %v1374_v59 = vadd.f32 %v1360_v43, %v1358_v46 }
 0x39f   :  { %v1340_v48 = vadd.f32 %v1339_v45, %v3309_v41  ;;  %v1361_v39 = vmul.f32 %v3309_v41, %v3309_v41 }
 0x3a0   :  { %v1362_v55 = vmul.f32 %v3313_v44, %v3313_v44  ;;  %v1334_v47 = vpop.f32.mrb[10].mxu0  ;;  %v1349_v60 = vadd.f32 %v1348_v50, %v3313_v44 }
 0x3a1   :  { %v3324_v54 = vadd.f32 %v1334_v47, %v1243_v33  ;;  %v1336_v57 = vpop.f32.mrb[11].mxu0 }
 0x3a2   :  { %v3327_v62 = vadd.f32 %v1336_v57, %v1247_v52  ;;  %v1375_v2 = vadd.f32 %v1374_v59, %v1362_v55  ;;  %v1359_v52 = vmul.f32 %v3303_v36, %v3303_v36 }
 0x3a3   :  { %v1341_v63 = vadd.f32 %v1340_v48, %v3324_v54  ;;  %v1363_v43 = vmul.f32 %v3324_v54, %v3324_v54 }
 0x3a4   :  { %v1350_v3 = vadd.f32 %v1349_v60, %v3327_v62  ;;  %v1364_v5 = vmul.f32 %v3327_v62, %v3327_v62  ;;  %v1365_v42 = vadd.f32 %v1359_v52, %v1357_v34 }
 0x3a5   :  { %v1342_v6 = vrot.slane %v1341_v63, 4 }
 0x3a6   :  { %v1351_v8 = vrot.slane %v1350_v3, 4  ;;  %v1376_v9 = vadd.f32 %v1375_v2, %v1364_v5  ;;  %v1366_v45 = vadd.f32 %v1365_v42, %v1361_v39 }
 0x3a7   :  { %v1343_v11 = vadd.f32 %v1342_v6, %v1341_v63 }
 0x3a8   :  { %v1352_v12 = vadd.f32 %v1351_v8, %v1350_v3  ;;  %v1377_v14 = vrot.slane %v1376_v9, 4  ;;  %v1367_v46 = vadd.f32 %v1366_v45, %v1363_v43 }
 0x3a9   :  { %v1344_v15 = vrot.slane %v1343_v11, 2 }
 0x3aa   :  { %v1353_v17 = vrot.slane %v1352_v12, 2  ;;  %v1378_v18 = vadd.f32 %v1377_v14, %v1376_v9  ;;  %v1368_v50 = vrot.slane %v1367_v46, 4  ;;  %v2872_v9 = vmov 1966171168  }
 0x3ab   :  { %v1345_v20 = vadd.f32 %v1344_v15, %v1343_v11  ;;  %v1719_v11 = vunpack.c.l.s4 %v2872_v9 }
 0x3ac   :  { %v1354_v21 = vadd.f32 %v1353_v17, %v1352_v12  ;;  %v1379_v23 = vrot.slane %v1378_v18, 2 }
 0x3ad   :  { %v1346_v24 = vrot.slane %v1345_v20, 1  ;;  %v1720_v12 = vunpack.c.0.s8 %v1719_v11 }
 0x3ae   :  { %v1355_v26 = vrot.slane %v1354_v21, 1  ;;  %v1380_v28 = vadd.f32 %v1379_v23, %v1378_v18 }
 0x3af   :  { %v1347_v32 = vadd.f32 %v1346_v24, %v1345_v20  ;;  %v1638_v20 = vld [vmem:[%s3396_s5] sm:$0x3]  ;;  %s2873_s5 = smov [#allocation10]  }
 0x3b0   :  { %v1356_v30 = vadd.f32 %v1355_v26, %v1354_v21  ;;  %v1381_v51 = vrot.slane %v1380_v28, 1 }
 0x3b2   :  { %1479 = vmatprep.mubr.f32.mxu0 %v1356_v30  ;;  %v1382_v33 = vadd.f32 %v1381_v51, %v1380_v28 }
 0x3b3   :  { %1480 = vmatmul.mubr.f32.vlgmr.msra.gmra.mrb[12].mxu0 %v1347_v32 }
 0x3b4   :  { %2687 = vmatpush3.bf16.msra.mxu0 %v3155_v38  ;;  %1550 = vmatprep.mubr.f32.mxu0 %v1382_v33  ;;  %v1369_v38 = vadd.f32 %v1368_v50, %v1367_v46 }
 0x3b5   :  { %2689 = vmatprep.subr.bf16.mxu0 %v3167_v49 }
 0x3b6   :  { %v1370_v55 = vrot.slane %v1369_v38, 2 }
 0x3b8   :  { %2691 = vmatpush3.bf16.msra.mxu0 %v3175_v56  ;;  %v1371_v49 = vadd.f32 %v1370_v55, %v1369_v38 }
 0x3b9   :  { %2693 = vmatprep.subr.bf16.mxu0 %v3185_v53 }
 0x3ba   :  { %v1372_v56 = vrot.slane %v1371_v49, 1 }
 0x3bc   :  { %2695 = vmatpush3.bf16.msra.mxu0 %v3193_v58  ;;  %v1373_v53 = vadd.f32 %v1372_v56, %v1371_v49  ;;  %v1560_v58 = vld [vmem:[#allocation9 + $0x8] sm:$0xff] }
 0x3bd   :  { %2697 = vmatprep.subr.bf16.mxu0 %v3203_v61  ;;  %v1562_v61 = vld [vmem:[#allocation9 + $0x18] sm:$0xff] }
 0x3c0   :  { %2699 = vmatpush3.bf16.msra.mxu0 %v3211_v1  ;;  %v2716_v1 = vpack.c.bf16 %v1562_v61, %v1560_v58 }
 0x3c1   :  { %2701 = vmatprep.subr.bf16.mxu0 %v3221_v4  ;;  %v1559_v4 = vld [vmem:[#allocation9] sm:$0xff] }
 0x3c2   :  { %2717 = vmatprep.subr.bf16.mxu1 %v2716_v1 }
 0x3c4   :  { %2703 = vmatpush3.bf16.msra.mxu0 %v3229_v7  ;;  %v1561_v7 = vld [vmem:[#allocation9 + $0x10] sm:$0xff] }
 0x3c5   :  { %2705 = vmatprep.subr.bf16.mxu0 %v3239_v10  ;;  %v2718_v10 = vpack.c.bf16 %v1561_v7, %v1559_v4 }
 0x3c7   :  { %2719 = vmatpush1.bf16.msra.mxu1 %v2718_v10 }
 0x3c8   :  { %2707 = vmatpush3.bf16.msra.mxu0 %v3247_v13  ;;  %2721 = vmatprep.subr.bf16.mxu1 %v2716_v1 }
 0x3c9   :  { %2709 = vmatprep.subr.bf16.mxu0 %v3257_v16 }
 0x3cc   :  { %2711 = vmatpush3.bf16.msra.mxu0 %v3265_v19 }
 0x3cd   :  { %2713 = vmatprep.subr.bf16.mxu0 %v3275_v22 }
 0x3d0   :  { %2715 = vmatpush3.bf16.msra.mxu0 %v3283_v25 }
 0x3d3   :  { %1551 = vmatmul.mubr.f32.vlgmr.msra.gmra.mrb[14].mxu0 %v1373_v53 }
 0x486   :  { %v2042_v13 = vpop.f32.mrb[12].mxu0 }
 0x487   :  { %v2043_v16 = vpop.f32.mrb[13].mxu0 }
 0x488   :  { %v2044_v47 = vadd.f32 %v2043_v16, %v2042_v13 }
 0x48a   :  { %v1485_v19 = vmul.f32 0.001953125, %v2044_v47 }
 0x48c   :  { %1848 = vmatmul.mubr.msk.f32.vlgmr.msra.gmra.mrb[4].mxu1 %vm1563_vm2, %v1485_v19  ;;  %v1557_v57 = vmul.f32 %v1485_v19, %v1485_v19 }
 0x48d   :  { %2723 = vmatpush1.bf16.msra.mxu1 %v2718_v10  ;;  %1706 = vmatprep.mubr.f32.mxu1 %v2871_v0  ;;  %v1723_v0 = vsub.s32 %v1720_v12, %v3288_v27  ;;  %v1734_v27 = vld [vmem:[%s3397_s6] sm:$0x3]  ;;  %s1815_s6 = sshll.u32 %s2873_s5, 4  ;;  %s1816_s6 = int_to_ptr.vmem [resolvable:$true] %s1815_s6 }
 0x48e   :  { %s2836_s22 = scalar_lea.vmem %s1816_s6, 1024  ;;  %p2841_p11 = scmp.lt.s32.totalorder %s1816_s6, %s1816_s6 }
 0x48f   :  { %p2837_p10 = scmp.ne.s32.totalorder %s1816_s6, %s2836_s22  ;;  %p2842_p12 = scmp.lt.s32.totalorder %s2836_s22, %s2836_s22 }
 0x491   :  { %p2843_p13 = por %p2842_p12, %p2841_p11 }
 0x493   :  { %p2844_p0 = pnand %p2843_p13, %p2837_p10 }
 0x4a6   :  { %v2077_v22 = vpop.f32.mrb[14].mxu0 }
 0x4a7   :  { %v2078_v25 = vpop.f32.mrb[15].mxu0 }
 0x4a8   :  { %v2079_v48 = vadd.f32 %v2078_v25, %v2077_v22 }
 0x4aa   :  { %v1556_v59 = vmul.f32 0.001953125, %v2079_v48 }
 0x4ac   :  { %v1558_v60 = vsub.f32 %v1556_v59, %v1557_v57 }
 0x4ae   :  { %1849 = vmatmul.mubr.msk.f32.vlgmr.msra.gmra.mrb[6].mxu1 %vm1563_vm2, %v1558_v60 }
 0x55f   :  { %v1633_v63 = vpop.f32.mrb[4].mxu1 }
 0x560   :  { %v1635_v2 = vpop.f32.mrb[5].mxu1 }
 0x581   :  { %v1708_v3 = vpop.f32.mrb[6].mxu1 }
 0x582   :  { %v1709_v5 = vadd.f32 1e-05, %v1708_v3  ;;  %v1710_v6 = vpop.f32.mrb[7].mxu1 }
 0x583   :  { %v1711_v8 = vadd.f32 1e-05, %v1710_v6 }
 0x584   :  { %2766 = vrsqrt.f32 %v1709_v5 }
 0x585   :  { %2768 = vrsqrt.f32 %v1711_v8 }
 0x58e   :  { %v2767_v14 = vpop.eup %2766 }
 0x58f   :  { %v2769_v15 = vpop.eup %2768 }
 0x590   :  { %v1717_v17 = vcombine.low %v2767_v14, %v2769_v15 }
 0x592   :  { %v1724_v18 = vrot.slane %v1717_v17, %v1723_v0 }
 0x594   :  { %v1731_v21 = vrot.slane %v1724_v18, %v1723_v0 }
 0x596   :  { %v1733_v23 = vmul.f32 %v1731_v21, %v1638_v20 }
 0x598   :  { %v1739_v24 = vrot.slane %v1733_v23, %v3297_v31  ;;  %v1743_v26 = vrot.slane %v1733_v23, %v3291_v29 }
 0x59a   :  { %v1746_v28 = vmul.f32 %v1739_v24, %v1633_v63  ;;  %v1747_v30 = vmul.f32 %v1743_v26, %v1635_v2  ;;  %v1767_v34 = vmul.f32 %v1739_v24, %v3307_v40  ;;  %v1768_v39 = vmul.f32 %v1743_v26, %v3305_v37 }
 0x59b   :  { %v1769_v45 = vmul.f32 %v1739_v24, %v3303_v36  ;;  %v1770_v46 = vmul.f32 %v1743_v26, %v3301_v35  ;;  %v1771_v50 = vmul.f32 %v1739_v24, %v3309_v41  ;;  %v1772_v38 = vmul.f32 %v1743_v26, %v3313_v44 }
 0x59c   :  { %v1750_v51 = vcombine.low %v1746_v28, %v1747_v30  ;;  %v1773_v55 = vmul.f32 %v1739_v24, %v3324_v54  ;;  %v1774_v49 = vmul.f32 %v1743_v26, %v3327_v62 }
 0x59e   :  { %v1757_v52 = vrot.slane %v1750_v51, %v1723_v0 }
 0x5a0   :  { %v1764_v32 = vrot.slane %v1757_v52, %v1723_v0 }
 0x5a2   :  { %v1766_v33 = vsub.f32 %v1734_v27, %v1764_v32 }
 0x5a4   :  { %v1779_v42 = vrot.slane %v1766_v33, %v3297_v31  ;;  %v1783_v43 = vrot.slane %v1766_v33, %v3291_v29 }
 0x5a6   :  { %v1786_v56 = vadd.f32 %v1779_v42, %v1767_v34  ;;  %v1787_v40 = vadd.f32 %v1783_v43, %v1768_v39  ;;  %v1788_v53 = vadd.f32 %v1779_v42, %v1769_v45  ;;  %v1789_v37 = vadd.f32 %v1783_v43, %v1770_v46 }
 0x5a7   :  { %v1790_v31 = vadd.f32 %v1779_v42, %v1771_v50  ;;  %v1791_v29 = vadd.f32 %v1783_v43, %v1772_v38  ;;  %v1792_v58 = vadd.f32 %v1779_v42, %v1773_v55  ;;  %v1793_v36 = vadd.f32 %v1783_v43, %v1774_v49 }
 0x5a8   :  { %v1794_v61 = vmax.f32 %v1786_v56, 0.0  ;;  %v1795_v35 = vmax.f32 %v1787_v40, 0.0  ;;  %v1796_v1 = vmax.f32 %v1788_v53, 0.0  ;;  %v1797_v41 = vmax.f32 %v1789_v37, 0.0 }
 0x5a9   :  { %v1798_v4 = vmax.f32 %v1790_v31, 0.0  ;;  %v1799_v44 = vmax.f32 %v1791_v29, 0.0  ;;  %v1800_v7 = vmax.f32 %v1792_v58, 0.0  ;;  %v1801_v54 = vmax.f32 %v1793_v36, 0.0 }
 0x5aa   :  { %1802 = vst [vmem:[#allocation10] sm:$0xff] %v1794_v61  ;;  %1803 = vst [vmem:[#allocation10 + $0x8] sm:$0xff] %v1795_v35 }
 0x5ab   :  { %1804 = vst [vmem:[#allocation10 + $0x10] sm:$0xff] %v1796_v1  ;;  %1805 = vst [vmem:[#allocation10 + $0x18] sm:$0xff] %v1797_v41 }
 0x5ac   :  { %1806 = vst [vmem:[#allocation10 + $0x20] sm:$0xff] %v1798_v4  ;;  %1807 = vst [vmem:[#allocation10 + $0x28] sm:$0xff] %v1799_v44 }
 0x5ad   :  { %1808 = vst [vmem:[#allocation10 + $0x30] sm:$0xff] %v1800_v7  ;;  %1809 = vst [vmem:[#allocation10 + $0x38] sm:$0xff] %v1801_v54 }
 0x5ae   :  { %2847 = shalt.err (!%p2844_p0)
}
 0x5af   :  { %s2848_s27 = scalar_lea.hbm %s3400_s9, 1024 }
 0x5b0   :  { %p2849_p1 = scmp.ne.s32.totalorder %s3400_s9, %s2848_s27  ;;  %p2852_p2 = scmp.lt.u32.totalorder %s2848_s27, %s3400_s9 }
 0x5b2   :  { %p2854_p3 = pnand %p2852_p2, %p2849_p1 }
 0x5b4   :  { %2857 = shalt.err (!%p2854_p3)
}
 0x5b5   :  { %1821 = dma.vmem_to_hbm [thread:$0]  %s1816_s6, 1024, %s3400_s9, [#allocation6], %s2869_s1, %s2869_s1, %s2870_s12  }
 0x5b6   :  { %2862 = dma.done.wait [#allocation6], 1024  }
 0x5b7   :  { %2863 = vsyncadd [#allocation6], 4294966272 }
 0x5b8   :  { %1825 = vsyncpa [#allocation5], 1 }
 0x5b9   :  { %1826 = vsyncpa [#allocation8], 1 }
 0x5ba   :  { %1827 = vsyncpa [#allocation6], 1 }

</bundles_post_ra>
